<compile_context>
chip_gen: v7x
topology: tpu7x:2x2x1
jax: 0.10.0
libtpu: 0.0.40
codegen_flags: <defaults>
</compile_context>

<pallas_src>
import numpy as np
import jax
import jax.numpy as jnp
from jax.experimental import pallas as pl
from jax.experimental.pallas import tpu as pltpu

# --------------------------------------------------------------------------
# synthetic keypoint / skeleton metadata
# TODO(synk): openpifpaf uses the 17 COCO keypoints, COCO_PERSON_SKELETON,
# DENSER_COCO_PERSON_CONNECTIONS and the HFLIP table; a small synthetic set
# with identical structure is used here instead of the real constants.
NUM_KP = 5
KP_HFLIP = np.array([0, 2, 1, 4, 3])                   # left/right keypoint swap
SKELETON = [(0, 1), (0, 2), (1, 3), (2, 4), (1, 2)]    # 5 connections
DENSE_SKELETON = [(0, 3), (0, 4), (3, 4), (1, 4), (2, 3)]


def connection_hflip(skeleton, kp_flip):
    perm, flipped = [], []
    for a, b in skeleton:
        fa, fb = int(kp_flip[a]), int(kp_flip[b])
        if (fa, fb) in skeleton:
            perm.append(skeleton.index((fa, fb)))
            flipped.append(False)
        else:
            perm.append(skeleton.index((fb, fa)))
            flipped.append(True)
    return np.array(perm), np.array(flipped)


SKEL_PERM, SKEL_FLIPPED = connection_hflip(SKELETON, KP_HFLIP)
DENSE_PERM, DENSE_FLIPPED = connection_hflip(DENSE_SKELETON, KP_HFLIP)

CIN = 3                             # input image channels
CBASE = 16                          # base-net feature channels
PIF_C = 4 * NUM_KP                  # 20
PAF_C = 5 * len(SKELETON)           # 25
PAFD_C = 5 * len(DENSE_SKELETON)    # 25
COUT = PIF_C + PAF_C + PAFD_C       # 70 fused head channels
COUT_PAD = 72                       # padded to a multiple of 8 (full sublanes)


# --------------------------------------------------------------------------
# hflip-undo as a channel permutation + sign, baked into the head weights.
# dst channel c takes sign[c] * src channel src[c]  (spatial flip excluded).
def build_hflip_channel_map():
    src = np.arange(COUT)
    sign = np.ones(COUT, np.float32)
    k = NUM_KP
    # --- PIF block: conf[k], reg[k,2], scale[k] ---
    b0 = 0
    for i in range(k):
        src[b0 + i] = b0 + int(KP_HFLIP[i])                      # conf
        src[b0 + 3 * k + i] = b0 + 3 * k + int(KP_HFLIP[i])      # scale
        for j in range(2):                                       # reg (x, y)
            src[b0 + k + 2 * i + j] = b0 + k + 2 * int(KP_HFLIP[i]) + j
            if j == 0:
                sign[b0 + k + 2 * i + j] = -1.0                  # negate x

    # --- PAF blocks: conf[E], reg1[E,2], reg2[E,2] ---
    def paf(b0, e_cnt, perm, flipped):
        for e in range(e_cnt):
            src[b0 + e] = b0 + int(perm[e])                      # conf
            for j in range(2):
                r1_src = (3 * e_cnt) if flipped[e] else e_cnt    # endpoint swap
                r2_src = e_cnt if flipped[e] else (3 * e_cnt)
                src[b0 + e_cnt + 2 * e + j] = b0 + r1_src + 2 * int(perm[e]) + j
                src[b0 + 3 * e_cnt + 2 * e + j] = b0 + r2_src + 2 * int(perm[e]) + j
                if j == 0:
                    sign[b0 + e_cnt + 2 * e + j] = -1.0          # negate x
                    sign[b0 + 3 * e_cnt + 2 * e + j] = -1.0

    paf(PIF_C, len(SKELETON), SKEL_PERM, SKEL_FLIPPED)
    paf(PIF_C + PAF_C, len(DENSE_SKELETON), DENSE_PERM, DENSE_FLIPPED)
    return src, sign


HFLIP_SRC, HFLIP_SIGN = build_hflip_channel_map()


# --------------------------------------------------------------------------
# Pallas kernel: fused base-net (1x1 conv + ReLU) + concatenated heads
# (1x1 conv).  Channel-major: channels on sublanes, pixels on lanes.
def _fused_kernel(x_ref, wb_ref, bb_ref, wh_ref, bh_ref, o_ref):
    # x_ref : (CIN, TM)          pixel tile, channel-major
    # wb_ref: (CBASE, CIN)       base-net weight (transposed)
    # bb_ref: (CBASE, 1)         base-net bias
    # wh_ref: (COUT_PAD, CBASE)  per-set head weights (hflip-undo pre-baked)
    # bh_ref: (COUT_PAD, 1)      per-set head biases
    # o_ref : (COUT_PAD, TM)     fused head outputs (lane-dense, full sublanes)
    feat = jnp.dot(wb_ref[...], x_ref[...], preferred_element_type=jnp.float32)
    feat = jnp.maximum(feat + bb_ref[...], 0.0)
    out = jnp.dot(wh_ref[...], feat, preferred_element_type=jnp.float32)
    o_ref[...] = (out + bh_ref[...]).astype(o_ref.dtype)


def _choose_tm(m, n_sets, max_tm=8192, min_tm=512, min_steps=4):
    """Largest power-of-two tile (multiple of 128) keeping >= min_steps grid steps."""
    tm = max_tm
    while tm > min_tm and n_sets * ((m + tm - 1) // tm) < min_steps:
        tm //= 2
    return tm


def fused_base_and_heads(half_cols, wb_t, bb, wh_stack, bh_stack,
                         out_dtype=jnp.float32):
    """half_cols: list of n_sets arrays (CIN, M) channel-major pixel columns.
    wh_stack: (n_sets, COUT_PAD, CBASE); bh_stack: (n_sets, COUT_PAD, 1).
    Returns (n_sets, COUT_PAD, M_padded) channel-major head outputs."""
    n_sets = len(half_cols)
    cin, m = half_cols[0].shape
    cbase = wb_t.shape[0]
    cout_pad = wh_stack.shape[1]

    tm = _choose_tm(m, n_sets)
    mp = pl.cdiv(m, tm) * tm
    x_stack = jnp.stack(
        [jnp.pad(c, ((0, 0), (0, mp - m))) for c in half_cols])  # (n_sets, CIN, mp)

    # VMEM working set at tm=8192: ~2*96KB in + ~2*2.25MB out blocks
    # + ~2.8MB temporaries  ==> <8MB, fits default scoped VMEM on v5e/v6e/v7x.
    out = pl.pallas_call(
        _fused_kernel,
        out_shape=jax.ShapeDtypeStruct((n_sets, cout_pad, mp), out_dtype),
        grid_spec=pltpu.PrefetchScalarGridSpec(
            num_scalar_prefetch=0,
            grid=(n_sets, mp // tm),
            in_specs=[
                pl.BlockSpec((None, cin, tm), lambda s, i: (s, 0, i)),
                pl.BlockSpec((cbase, cin), lambda s, i: (0, 0)),
                pl.BlockSpec((cbase, 1), lambda s, i: (0, 0)),
                pl.BlockSpec((None, cout_pad, cbase), lambda s, i: (s, 0, 0)),
                pl.BlockSpec((None, cout_pad, 1), lambda s, i: (s, 0, 0)),
            ],
            out_specs=pl.BlockSpec((None, cout_pad, tm), lambda s, i: (s, 0, i)),
        ),
        compiler_params=pltpu.CompilerParams(
            dimension_semantics=("parallel", "parallel")),
    )(x_stack, wb_t, bb.reshape(cbase, 1), wh_stack, bh_stack)
    return out  # padded; callers slice per-variant windows


# --------------------------------------------------------------------------
# synthetic parameters (same structural shapes as base net + PIF/PAF heads)
def init_params(key):
    ks = jax.random.split(key, 8)
    return {
        "w_base": 0.1 * jax.random.normal(ks[0], (CIN, CBASE), jnp.float32),
        "b_base": 0.01 * jax.random.normal(ks[1], (CBASE,), jnp.float32),
        "w_pif": 0.1 * jax.random.normal(ks[2], (CBASE, PIF_C), jnp.float32),
        "b_pif": 0.01 * jax.random.normal(ks[3], (PIF_C,), jnp.float32),
        "w_paf": 0.1 * jax.random.normal(ks[4], (CBASE, PAF_C), jnp.float32),
        "b_paf": 0.01 * jax.random.normal(ks[5], (PAF_C,), jnp.float32),
        "w_pafd": 0.1 * jax.random.normal(ks[6], (CBASE, PAFD_C), jnp.float32),
        "b_pafd": 0.01 * jax.random.normal(ks[7], (PAFD_C,), jnp.float32),
    }


# --------------------------------------------------------------------------
# per-head output splitting (pure reshape glue on NCHW at the boundary)
def split_pif(out):                       # out: (n, 4*K, h, w)
    n, _, h, w = out.shape
    k = NUM_KP
    conf = out[:, :k]
    reg = out[:, k:3 * k].reshape(n, k, 2, h, w)
    scale = out[:, 3 * k:4 * k]
    return (conf, reg, scale)


def split_paf(out, n_conn):               # out: (n, 5*E, h, w)
    n, _, h, w = out.shape
    e = n_conn
    conf = out[:, :e]
    reg1 = out[:, e:3 * e].reshape(n, e, 2, h, w)
    reg2 = out[:, 3 * e:5 * e].reshape(n, e, 2, h, w)
    return (conf, reg1, reg2)


# --------------------------------------------------------------------------
# hflip-undo modules (used only by the pure-JAX reference; the Pallas path
# bakes the channel permutation / negation / endpoint swap into the weights)
def pif_hflip(conf, reg, scale):
    out = [jnp.flip(f[:, KP_HFLIP], axis=-1) for f in (conf, reg, scale)]
    out[1] = out[1].at[:, :, 0].multiply(-1.0)
    return tuple(out)


def paf_hflip(conf, reg1, reg2, perm, flipped):
    conf = jnp.flip(conf[:, perm], axis=-1)
    reg1 = jnp.flip(reg1[:, perm], axis=-1)
    reg2 = jnp.flip(reg2[:, perm], axis=-1)
    reg1 = reg1.at[:, :, 0].multiply(-1.0)
    reg2 = reg2.at[:, :, 0].multiply(-1.0)
    fmask = jnp.asarray(flipped)[None, :, None, None, None]
    new_reg1 = jnp.where(fmask, reg2, reg1)
    new_reg2 = jnp.where(fmask, reg1, reg2)
    return (conf, new_reg1, new_reg2)


def apply_hflip_undo(head_outputs):
    head_outputs = list(head_outputs)
    for mscale_i in range(5, 10):
        head_i = mscale_i * 3
        head_outputs[head_i] = pif_hflip(*head_outputs[head_i])
        head_outputs[head_i + 1] = paf_hflip(
            *head_outputs[head_i + 1], SKEL_PERM, SKEL_FLIPPED)
        head_outputs[head_i + 2] = paf_hflip(
            *head_outputs[head_i + 2], DENSE_PERM, DENSE_FLIPPED)
    return head_outputs


# --------------------------------------------------------------------------
# ShellMultiScale.forward
def reduce_input(x, reduction):
    if reduction == 1.5:
        y_idx = np.array([i for i in range(x.shape[2]) if i % 3 != 2])
        x_idx = np.array([i for i in range(x.shape[3]) if i % 3 != 2])
        red = x[:, :, y_idx, :]
        red = red[:, :, :, x_idx]
        return red
    return x[:, :, ::reduction, ::reduction]


def shell_multiscale_forward(x, params, include_hflip=True,
                             out_dtype=jnp.float32):
    """Pallas-fused ShellMultiScale forward: NCHW in, list of head tuples out."""
    hflips = [False, True] if include_hflip else [False]
    reductions = [1, 1.5, 2, 3, 5]

    # 1) build per-half channel-major pixel columns (cheap glue; <5% of bytes).
    shapes, half_cols = [], []
    for hflip in hflips:
        cols = []
        for reduction in reductions:
            r = reduce_input(x, reduction)
            if hflip:
                r = jnp.flip(r, axis=3)
            n, c, h, w = r.shape
            if not hflip:
                shapes.append((n, h, w))
            cols.append(jnp.moveaxis(r, 1, 0).reshape(c, n * h * w))
        half_cols.append(jnp.concatenate(cols, axis=1))     # (CIN, M)

    n_sets = len(hflips)

    # 2) weight sets: set 0 = plain heads; set 1 = hflip-undo pre-baked.
    wb_t = params["w_base"].T                                          # (CBASE, CIN)
    wh_t = jnp.concatenate(
        [params["w_pif"], params["w_paf"], params["w_pafd"]], axis=1).T  # (COUT, CBASE)
    bh = jnp.concatenate(
        [params["b_pif"], params["b_paf"], params["b_pafd"]])            # (COUT,)
    wh_sets, bh_sets = [wh_t], [bh]
    if include_hflip:
        sign = jnp.asarray(HFLIP_SIGN)
        wh_sets.append(sign[:, None] * wh_t[HFLIP_SRC])
        bh_sets.append(sign * bh[HFLIP_SRC])
    pad = COUT_PAD - COUT
    wh_stack = jnp.stack([jnp.pad(w_, ((0, pad), (0, 0))) for w_ in wh_sets])
    bh_stack = jnp.stack([jnp.pad(b_, ((0, pad),)) for b_ in bh_sets]
                         ).reshape(n_sets, COUT_PAD, 1)

    # 3) one fused Pallas kernel: base net + all three heads, all variants,
    #    both hflip weight sets (selected by grid axis 0).
    out_all = fused_base_and_heads(half_cols, wb_t, params["b_base"],
                                   wh_stack, bh_stack, out_dtype)
    out_all = out_all.astype(jnp.float32)

    # 4) split per-variant in CHANNEL-MAJOR; only the spatial width un-flip and
    #    the final NCHW transpose happen outside the kernel.
    head_outputs = []
    for s, hflip in enumerate(hflips):
        off = 0
        for (n, h, w) in shapes:
            mvar = n * h * w
            o = out_all[s, :COUT, off:off + mvar].reshape(COUT, n, h, w)
            off += mvar
            if hflip:
                o = jnp.flip(o, axis=-1)          # undo the input width flip
            o = jnp.moveaxis(o, 0, 1)             # final consumer boundary -> NCHW
            pif = o[:, :PIF_C]
            paf = o[:, PIF_C:PIF_C + PAF_C]
            pafd = o[:, PIF_C + PAF_C:PIF_C + PAF_C + PAFD_C]
            head_outputs += [
                split_pif(pif),
                split_paf(paf, len(SKELETON)),
                split_paf(pafd, len(DENSE_SKELETON)),
            ]
    # TODO(synk): process_heads callback is None in this synthetic setup.
    return head_outputs


# --------------------------------------------------------------------------
# pure-JAX reference (mirrors the original per-module structure)
def conv1x1_ref(x_nchw, w, b, *, relu=False):
    y = jnp.einsum("nchw,cd->ndhw", x_nchw, w) + b[None, :, None, None]
    return jnp.maximum(y, 0.0) if relu else y


def shell_multiscale_forward_ref(x, params, include_hflip=True):
    head_outputs = []
    for hflip in ([False, True] if include_hflip else [False]):
        for reduction in [1, 1.5, 2, 3, 5]:
            r = reduce_input(x, reduction)
            if hflip:
                r = jnp.flip(r, axis=3)
            feat = conv1x1_ref(r, params["w_base"], params["b_base"], relu=True)
            pif = conv1x1_ref(feat, params["w_pif"], params["b_pif"])
            paf = conv1x1_ref(feat, params["w_paf"], params["b_paf"])
            pafd = conv1x1_ref(feat, params["w_pafd"], params["b_pafd"])
            head_outputs += [
                split_pif(pif),
                split_paf(paf, len(SKELETON)),
                split_paf(pafd, len(DENSE_SKELETON)),
            ]
    if include_hflip:
        head_outputs = apply_hflip_undo(head_outputs)
    return head_outputs


# --------------------------------------------------------------------------
if __name__ == "__main__":
    x = jax.random.normal(jax.random.PRNGKey(0), (2, 3, 24, 24), jnp.float32)
    params = init_params(jax.random.PRNGKey(1))

    fwd = jax.jit(lambda xx, pp: shell_multiscale_forward(
        xx, pp, include_hflip=True))
    outs = fwd(x, params)
    jax.block_until_ready(jax.tree_util.tree_leaves(outs))

    assert len(outs) == 30                      # 2 hflip x 5 reductions x 3 heads
    assert all(len(t) == 3 for t in outs)

    # end-to-end correctness check against the pure-JAX reference (f32 path)
    refs = shell_multiscale_forward_ref(x, params, include_hflip=True)
    for got_t, ref_t in zip(outs, refs):
        for g, r in zip(got_t, ref_t):
            np.testing.assert_allclose(np.asarray(g), np.asarray(r),
                                       rtol=2e-3, atol=2e-3)

    print("KERNEL_OK")
</pallas_src>

<mosaic_0001>
module attributes {stable_mosaic.version = 11 : i64} {
  func.func @_fused_kernel(%arg0: i32, %arg1: i32, %arg2: memref<1x3x2048xf32, #tpu.memory_space<vmem>>, %arg3: memref<16x3xf32, #tpu.memory_space<vmem>>, %arg4: memref<16x1xf32, #tpu.memory_space<vmem>>, %arg5: memref<1x72x16xf32, #tpu.memory_space<vmem>>, %arg6: memref<1x72x1xf32, #tpu.memory_space<vmem>>, %arg7: memref<1x72x2048xf32, #tpu.memory_space<vmem>>) attributes {dimension_semantics = [#tpu.dimension_semantics<parallel>, #tpu.dimension_semantics<parallel>], iteration_bounds = array<i64: 2, 2>, scalar_prefetch = 0 : i64, scratch_operands = 0 : i64, tpu.core_type = #tpu.core_type<tc>, window_params = [{transform_indices = @transform_0, window_bounds = array<i64: 1, 3, 2048>}, {pipeline_mode = #tpu.pipeline_mode<synchronous>, transform_indices = @transform_1, window_bounds = array<i64: 16, 3>}, {pipeline_mode = #tpu.pipeline_mode<synchronous>, transform_indices = @transform_2, window_bounds = array<i64: 16, 1>}, {transform_indices = @transform_3, window_bounds = array<i64: 1, 72, 16>}, {transform_indices = @transform_4, window_bounds = array<i64: 1, 72, 1>}, {transform_indices = @transform_5, window_bounds = array<i64: 1, 72, 2048>}]} {
    %c0 = arith.constant 0 : index
    %c0_0 = arith.constant 0 : index
    %0 = vector.load %arg3[%c0, %c0_0] : memref<16x3xf32, #tpu.memory_space<vmem>>, vector<16x3xf32>
    %c0_1 = arith.constant 0 : index
    %c0_2 = arith.constant 0 : index
    %c0_3 = arith.constant 0 : index
    %1 = vector.load %arg2[%c0_1, %c0_2, %c0_3] : memref<1x3x2048xf32, #tpu.memory_space<vmem>>, vector<1x3x2048xf32>
    %2 = vector.shape_cast %1 : vector<1x3x2048xf32> to vector<3x2048xf32>
    %cst = arith.constant dense<0.000000e+00> : vector<16x2048xf32>
    %3 = tpu.matmul %0, %2, %cst {dimension_numbers = #tpu.dot_dimension_numbers<[1], [0], [0], [1], [0, 0, 1, 1], [], []>} : vector<16x3xf32>, vector<3x2048xf32>, vector<16x2048xf32> -> vector<16x2048xf32>
    %c0_4 = arith.constant 0 : index
    %c0_5 = arith.constant 0 : index
    %4 = vector.load %arg4[%c0_4, %c0_5] : memref<16x1xf32, #tpu.memory_space<vmem>>, vector<16x1xf32>
    %5 = vector.broadcast %4 : vector<16x1xf32> to vector<16x2048xf32>
    %6 = arith.addf %3, %5 : vector<16x2048xf32>
    %cst_6 = arith.constant 0.000000e+00 : f32
    %7 = vector.broadcast %cst_6 : f32 to vector<16x2048xf32>
    %8 = arith.maximumf %6, %7 : vector<16x2048xf32>
    %c0_7 = arith.constant 0 : index
    %c0_8 = arith.constant 0 : index
    %c0_9 = arith.constant 0 : index
    %9 = vector.load %arg5[%c0_7, %c0_8, %c0_9] : memref<1x72x16xf32, #tpu.memory_space<vmem>>, vector<1x72x16xf32>
    %10 = vector.shape_cast %9 : vector<1x72x16xf32> to vector<72x16xf32>
    %cst_10 = arith.constant dense<0.000000e+00> : vector<72x2048xf32>
    %11 = tpu.matmul %10, %8, %cst_10 {dimension_numbers = #tpu.dot_dimension_numbers<[1], [0], [0], [1], [0, 0, 1, 1], [], []>} : vector<72x16xf32>, vector<16x2048xf32>, vector<72x2048xf32> -> vector<72x2048xf32>
    %c0_11 = arith.constant 0 : index
    %c0_12 = arith.constant 0 : index
    %c0_13 = arith.constant 0 : index
    %12 = vector.load %arg6[%c0_11, %c0_12, %c0_13] : memref<1x72x1xf32, #tpu.memory_space<vmem>>, vector<1x72x1xf32>
    %13 = vector.shape_cast %12 : vector<1x72x1xf32> to vector<72x1xf32>
    %14 = vector.broadcast %13 : vector<72x1xf32> to vector<72x2048xf32>
    %15 = arith.addf %11, %14 : vector<72x2048xf32>
    %c0_14 = arith.constant 0 : index
    %c0_15 = arith.constant 0 : index
    %c0_16 = arith.constant 0 : index
    %16 = vector.load %arg7[%c0_14, %c0_15, %c0_16] : memref<1x72x2048xf32, #tpu.memory_space<vmem>>, vector<1x72x2048xf32>
    %17 = vector.shape_cast %16 : vector<1x72x2048xf32> to vector<72x2048xf32>
    %18 = vector.shape_cast %15 : vector<72x2048xf32> to vector<1x72x2048xf32>
    tpu.vector_store %arg7[%c0_14, %c0_15, %c0_16], %18 {strides = array<i32>} : memref<1x72x2048xf32, #tpu.memory_space<vmem>>, vector<1x72x2048xf32>,
    return
  }
  func.func @transform_0(%arg0: i32, %arg1: i32) -> (i32, i32, i32) {
    %c0_i32 = arith.constant 0 : i32
    %c0_i32_0 = arith.constant 0 : i32
    return %arg0, %c0_i32, %arg1 : i32, i32, i32
  }
  func.func @transform_1(%arg0: i32, %arg1: i32) -> (i32, i32) {
    %c0_i32 = arith.constant 0 : i32
    %c0_i32_0 = arith.constant 0 : i32
    %c0_i32_1 = arith.constant 0 : i32
    return %c0_i32, %c0_i32_0 : i32, i32
  }
  func.func @transform_2(%arg0: i32, %arg1: i32) -> (i32, i32) {
    %c0_i32 = arith.constant 0 : i32
    %c0_i32_0 = arith.constant 0 : i32
    %c0_i32_1 = arith.constant 0 : i32
    return %c0_i32, %c0_i32_0 : i32, i32
  }
  func.func @transform_3(%arg0: i32, %arg1: i32) -> (i32, i32, i32) {
    %c0_i32 = arith.constant 0 : i32
    %c0_i32_0 = arith.constant 0 : i32
    %c0_i32_1 = arith.constant 0 : i32
    return %arg0, %c0_i32, %c0_i32_0 : i32, i32, i32
  }
  func.func @transform_4(%arg0: i32, %arg1: i32) -> (i32, i32, i32) {
    %c0_i32 = arith.constant 0 : i32
    %c0_i32_0 = arith.constant 0 : i32
    %c0_i32_1 = arith.constant 0 : i32
    return %arg0, %c0_i32, %c0_i32_0 : i32, i32, i32
  }
  func.func @transform_5(%arg0: i32, %arg1: i32) -> (i32, i32, i32) {
    %c0_i32 = arith.constant 0 : i32
    %c0_i32_0 = arith.constant 0 : i32
    return %arg0, %c0_i32, %arg1 : i32, i32, i32
  }
}

</mosaic_0001>

<bundles_post_ra>
// kernel: mul.9
= control target key start
LH: loop header
LB: loop body
LE: loop exit
PB: predicated region body
PF: predicated region fallthrough
CT: control target
= control target key end

     0   :  { %s34_s0 = inlined_call_operand.vmem [shape: f32[70], index: 0, kind: input, shape index: {}]   ;;  %s35_s1 = inlined_call_operand.vmem [shape: f32[70], index: 1, kind: input, shape index: {}]   ;;  %s36_s2 = inlined_call_operand.vmem [shape: f32[70], index: 2, kind: output, shape index: {}]  }
   0x1   :  { %v3_v0 = vld [vmem:[%s34_s0] sm:$0x1] }
   0x2   :  { %v4_v1 = vld [vmem:[%s35_s1] sm:$0x1] }
   0x3   :  { %v7_v2 = vmul.f32 %v4_v1, %v3_v0 }
   0x5   :  { %9 = vst [vmem:[%s36_s2] sm:$0x1] %v7_v2 }

// kernel: _lambda_.1
= control target key start
LH: loop header
LB: loop body
LE: loop exit
PB: predicated region body
PF: predicated region fallthrough
CT: control target
= control target key end

     0   :  { %s2922_s18 = smov 0   ;;  %s2924_s19 = smov 0   ;;  %s4013_s0 = inlined_call_operand.vmem [shape: f32[2,3,4096], index: 0, kind: input, shape index: {}]   ;;  %s4014_s1 = inlined_call_operand.vmem [shape: f32[16,3], index: 1, kind: input, shape index: {}]   ;;  %s4015_s2 = inlined_call_operand.vmem [shape: f32[16,1], index: 2, kind: input, shape index: {}]   ;;  %s4016_s3 = inlined_call_operand.vmem [shape: f32[2,72,16], index: 3, kind: input, shape index: {}]   ;;  %s4017_s4 = inlined_call_operand.vmem [shape: f32[2,72,1], index: 4, kind: input, shape index: {}]   ;;  %s4018_s5 = inlined_call_operand.vmem [shape: f32[2,72,4096], index: 5, kind: output, shape index: {}]  }
   0x1   :  { %s2926_s20 = smov 0   ;;  %s2928_s21 = smov 0  }
   0x2   :  { %s2930_s22 = smov 0   ;;  %s2932_s23 = smov 0  }
   0x3   :  { %s2934_s24 = smov 0  }
   0x4 LB: > { %s24_s25 = sadd.s32 1, %s2880_s22  ;;  %s27_s26 = sadd.s32 1, %s2884_s23  ;;  %s2888_s24 = sphi %s2934_s24, %s15_s24   ;;  %s2884_s23 = sphi %s2932_s23, %s4025_s23   ;;  %s2880_s22 = sphi %s2930_s22, %s4024_s22   ;;  %s2876_s21 = sphi %s2928_s21, %s4023_s21   ;;  %s2872_s20 = sphi %s2926_s20, %s4022_s20   ;;  %s2868_s19 = sphi %s2924_s19, %s4021_s19   ;;  %s2864_s18 = sphi %s2922_s18, %s4020_s18  }
   0x5   : > { %p25_p0 = scmp.ge.s32.totalorder %s24_s25, 2  ;;  %s2613_s27 = sadd.s32 4294967295, %s2888_s24  }
   0x6   : > { %p168_p1 = scmp.ne.s32.totalorder %s2868_s19, %s2864_s18  ;;  %p169_p2 = scmp.eq.s32.totalorder %s2613_s27, 3 }
   0x7   : > { %s4027_s25 = smov (%p25_p0, %s24_s25), 0  ;;  %s4029_s26 = smov (!%p25_p0, %s27_s26), %s2884_s23 }
   0x8   : > { %s154_s28 = ssub.s32 %s2880_s22, %s4027_s25  ;;  %p29_p3 = scmp.ge.s32.totalorder %s4029_s26, 2 }
   0x9   : > { %p2617_p4 = scmp.ge.s32.totalorder %s2888_s24, 1  ;;  %p2966_p5 = por %p169_p2, %p168_p1 }
   0xa   : > { %p228_p6 = scmp.lt.s32.totalorder %s2888_s24, 5  ;;  %s4031_s26 = smov (%p29_p3, %s4029_s26), 0 }
   0xb   : > { %s153_s30 = ssub.s32 %s2884_s23, %s4031_s26  ;;  %s158_s7 = sadd.s32 1, %s2868_s19 }
   0xc   : > { %p229_p7 = pnand %p2617_p4, %p228_p6  ;;  %s155_s6 = sor.u32 %s154_s28, %s153_s30 }
   0xd   : > { %p156_p8 = scmp.eq.s32.totalorder %s155_s6, 0  ;;  %s2979_s9 = sshll.u32 (!%p229_p7), %s2872_s20, 4  ;;  %v2890_v0 = vmov (!%p229_p7), 0.0   ;;  %v300_v1 = vld [vmem:[%s4015_s2] sm:$0xff] (!%p229_p7)  ;;  %v2891_v2 = vmov (!%p229_p7), 0   ;;  %v301_v3 = vld [vmem:[%s4015_s2 + $0x8] sm:$0xff] (!%p229_p7) }
   0xe   : > { %232 = sbr.rel (%p229_p7) target bundleno = 673 (0x2a1), region = 40  ;;  %p270_p9 = scmp.lt.s32.totalorder (!%p229_p7), %s2876_s21, 1  ;;  %432 = vmatprep.mubr.f32.mxu0 (!%p229_p7), %v2890_v0  ;;  %509 = vmatprep.mubr.f32.mxu1 (!%p229_p7), %v2890_v0  ;;  %vm335_vm0 = vcmask (!%p229_p7), 1042432   ;;  %v3008_v10 = vld [vmem:[%s4014_s1] sm:$0xff] (!%p229_p7)  ;;  %vm328_vm1 = vcmask (!%p229_p7), 23552   ;;  %v291_v15 = vld [vmem:[%s4014_s1 + $0x8] sm:$0xff] (!%p229_p7) }
   0xf   : > { %s2977_s8 = scalar_select %p156_p8, %s2868_s19, %s158_s7  }
  0x10   : > { %p272_p10 = scmp.lt.s32.totalorder (!%p229_p7), %s2979_s9, 31  ;;  %2824 = vset.pattern.permute.xlu0 (!%p229_p7), %v2891_v2  ;;  %2825 = vset.pattern.permute.xlu1 (!%p229_p7), %v2891_v2  ;;  %vm1079_vm2 = vcmask (!%p229_p7), 130048  }
  0x11   : > { %304 = vperm.xlu0 (!%p229_p7), %2824, %v300_v1  }
  0x15   : > { %s2989_s12 = scalar_select %p270_p9, %s2876_s21, 1  ;;  %309 = vperm.xlu0 %2824, %v301_v3  }
  0x16   : > { %s273_s13 = scalar_select %p272_p10, %s2979_s9, 31 }
  0x17   : > { %s2619_s14 = sshll.u32 %s2989_s12, 5  ;;  %s2764_s10 = smul.u32 72, %s2989_s12 }
  0x18   : > { %s275_s17 = sadd.s32 %s2619_s14, %s273_s13  ;;  %s266_s12 = sand.u32 1, %s2864_s18  }
  0x19   : > { %s2620_s20 = sshll.u32 %s275_s17, 2  ;;  %s3031_s16 = scalar_lea.vmem %s4017_s4, %s2764_s10 }
  0x1a   : > { %s2999_s30 = scalar_lea.vmem %s4013_s0, %s2620_s20  ;;  %v1027_v20 = vld [vmem:[%s3031_s16 + $0x10] sm:$0xff]  ;;  %v1029_v23 = vld [vmem:[%s3031_s16 + $0x20] sm:$0xff]  ;;  %v1026_v27 = vld [vmem:[%s3031_s16 + $0x8] sm:$0xff]  ;;  %s3107_s27 = scalar_lea.vmem %s4016_s3, %s2764_s10 }
  0x1b   : > { %v292_v4 = vld [vmem:[%s2999_s30] sm:$0x77]  ;;  %v293_v5 = vld [vmem:[%s2999_s30 + $0x8] sm:$0x77]  ;;  %v294_v6 = vld [vmem:[%s2999_s30 + $0x10] sm:$0x77]  ;;  %1046 = vperm.xlu0 %2824, %v1027_v20  }
  0x1c   : > { %v320_v7 = vcombine.high %v292_v4, %v292_v4  ;;  %v321_v8 = vcombine.high %v293_v5, %v293_v5  ;;  %v295_v9 = vld [vmem:[%s2999_s30 + $0x18] sm:$0x77]  ;;  %v322_v11 = vcombine.high %v294_v6, %v294_v6  ;;  %v296_v13 = vld [vmem:[%s2999_s30 + $0x20] sm:$0x77]  ;;  %v297_v14 = vld [vmem:[%s2999_s30 + $0x28] sm:$0x77] }
  0x1d   : > { %v323_v12 = vcombine.high %v295_v9, %v295_v9  ;;  %v324_v16 = vcombine.high %v296_v13, %v296_v13  ;;  %v325_v17 = vcombine.high %v297_v14, %v297_v14  ;;  %v298_v18 = vld [vmem:[%s2999_s30 + $0x30] sm:$0x77]  ;;  %v299_v19 = vld [vmem:[%s2999_s30 + $0x38] sm:$0x77]  ;;  %v1033_v25 = vld [vmem:[%s3031_s16 + $0x40] sm:$0xff]  ;;  %s2763_s28 = smul.u32 1152, %s266_s12 }
  0x1e   : > { %2623 = vmatprep.subr.msk.mxu0 %vm335_vm0, %v320_v7  ;;  %2627 = vmatprep.subr.msk.mxu1 %vm335_vm0, %v321_v8  ;;  %v326_v21 = vcombine.high %v298_v18, %v298_v18  ;;  %v327_v22 = vcombine.high %v299_v19, %v299_v19  ;;  %v1031_v24 = vld [vmem:[%s3031_s16 + $0x30] sm:$0xff]  ;;  %v1025_v26 = vld [vmem:[%s3031_s16] sm:$0xff]  ;;  %v1028_v28 = vld [vmem:[%s3031_s16 + $0x18] sm:$0xff]  ;;  %s2765_s18 = smul.u32 (%p2966_p5), 288, %s2876_s21 }
  0x1f   : > { %2624 = vmatpush1.msk.msra.mxu0 %vm335_vm0, %v292_v4  ;;  %2628 = vmatpush1.msk.msra.mxu1 %vm335_vm0, %v293_v5  ;;  %v1030_v29 = vld [vmem:[%s3031_s16 + $0x28] sm:$0xff]  ;;  %v1032_v33 = vld [vmem:[%s3031_s16 + $0x38] sm:$0xff]  ;;  %s3395_s30 = scalar_lea.vmem [#allocation2], %s2763_s28 }
  0x20   : > { %2625 = vmatmul.mubr.msk.f32.vlgmr.msra.gmra.mrb[0].mxu0 %vm328_vm1, %v3008_v10  ;;  %2629 = vmatmul.mubr.msk.f32.vlgmr.msra.gmra.mrb[0].mxu1 %vm328_vm1, %v3008_v10  ;;  %s2212_s29 = sadd.s32 (%p2966_p5), %s2765_s18, %s2979_s9 }
  0x21   : > { %438 = vmatprep.mubr.f32.mxu0 %v2890_v0  ;;  %515 = vmatprep.mubr.f32.mxu1 %v2890_v0  ;;  %s2728_s6 = sshll.u32 (%p2966_p5), %s2212_s29, 3 }
  0x22   : > { %2631 = vmatprep.subr.msk.mxu0 %vm335_vm0, %v322_v11  ;;  %2635 = vmatprep.subr.msk.mxu1 %vm335_vm0, %v323_v12  ;;  %v3116_v12 = vld [vmem:[%s3107_s27] sm:$0xff]  ;;  %s3714_s21 = scalar_lea.vmem (%p2966_p5), %s4018_s5, %s2728_s6 }
  0x23   : > { %2632 = vmatpush1.msk.msra.mxu0 %vm335_vm0, %v294_v6  ;;  %2636 = vmatpush1.msk.msra.mxu1 %vm335_vm0, %v295_v9 }
  0x24   : > { %2626 = vmatmul.mubr.msk.f32.gmra.mrb[2].mxu0 %vm328_vm1, %v291_v15  ;;  %2630 = vmatmul.mubr.msk.f32.gmra.mrb[2].mxu1 %vm328_vm1, %v291_v15 }
  0x25   : > { %586 = vmatprep.mubr.f32.mxu0 %v2890_v0  ;;  %663 = vmatprep.mubr.f32.mxu1 %v2890_v0 }
  0x26   : > { %2639 = vmatprep.subr.msk.mxu0 %vm335_vm0, %v324_v16  ;;  %2643 = vmatprep.subr.msk.mxu1 %vm335_vm0, %v325_v17 }
  0x27   : > { %1056 = vperm.xlu0 %2824, %v1029_v23   ;;  %1036 = vperm.xlu1 %2825, %v1025_v26  }
  0x28   : > { %2633 = vmatmul.mubr.msk.f32.vlgmr.msra.gmra.mrb[4].mxu0 %vm328_vm1, %v3008_v10  ;;  %2637 = vmatmul.mubr.msk.f32.vlgmr.msra.gmra.mrb[4].mxu1 %vm328_vm1, %v3008_v10 }
  0x29   : > { %592 = vmatprep.mubr.f32.mxu0 %v2890_v0  ;;  %669 = vmatprep.mubr.f32.mxu1 %v2890_v0 }
  0x2a   : > { %2640 = vmatpush1.msk.msra.mxu0 %vm335_vm0, %v296_v13  ;;  %2644 = vmatpush1.msk.msra.mxu1 %vm335_vm0, %v297_v14 }
  0x2b   : > { %2647 = vmatprep.subr.msk.mxu0 %vm335_vm0, %v326_v21  ;;  %2651 = vmatprep.subr.msk.mxu1 %vm335_vm0, %v327_v22 }
  0x2c   : > { %2634 = vmatmul.mubr.msk.f32.gmra.mrb[6].mxu0 %vm328_vm1, %v291_v15  ;;  %2638 = vmatmul.mubr.msk.f32.gmra.mrb[6].mxu1 %vm328_vm1, %v291_v15 }
  0x2d   : > { %740 = vmatprep.mubr.f32.mxu0 %v2890_v0  ;;  %817 = vmatprep.mubr.f32.mxu1 %v2890_v0 }
  0x2e   : > { %1066 = vperm.xlu0 %2824, %v1031_v24   ;;  %1041 = vperm.xlu1 %2825, %v1026_v27  }
  0x30   : > { %2641 = vmatmul.mubr.msk.f32.vlgmr.msra.gmra.mrb[8].mxu0 %vm328_vm1, %v3008_v10  ;;  %2645 = vmatmul.mubr.msk.f32.vlgmr.msra.gmra.mrb[8].mxu1 %vm328_vm1, %v3008_v10 }
  0x31   : > { %746 = vmatprep.mubr.f32.mxu0 %v2890_v0  ;;  %823 = vmatprep.mubr.f32.mxu1 %v2890_v0 }
  0x32   : > { %2648 = vmatpush1.msk.msra.mxu0 %vm335_vm0, %v298_v18  ;;  %2652 = vmatpush1.msk.msra.mxu1 %vm335_vm0, %v299_v19 }
  0x33   : > { %1076 = vperm.xlu0 %2824, %v1033_v25   ;;  %1051 = vperm.xlu1 %2825, %v1028_v28  }
  0x34   : > { %2642 = vmatmul.mubr.msk.f32.gmra.mrb[10].mxu0 %vm328_vm1, %v291_v15  ;;  %2646 = vmatmul.mubr.msk.f32.gmra.mrb[10].mxu1 %vm328_vm1, %v291_v15 }
  0x35   : > { %894 = vmatprep.mubr.f32.mxu0 %v2890_v0  ;;  %971 = vmatprep.mubr.f32.mxu1 %v2890_v0 }
  0x37   : > { %1061 = vperm.xlu1 %2825, %v1030_v29   ;;  %v3126_v29 = vld [vmem:[%s3107_s27 + $0x8] sm:$0xff] }
  0x38   : > { %2649 = vmatmul.mubr.msk.f32.vlgmr.msra.gmra.mrb[12].mxu0 %vm328_vm1, %v3008_v10  ;;  %2653 = vmatmul.mubr.msk.f32.vlgmr.msra.gmra.mrb[12].mxu1 %vm328_vm1, %v3008_v10 }
  0x39   : > { %900 = vmatprep.mubr.f32.mxu0 %v2890_v0  ;;  %977 = vmatprep.mubr.f32.mxu1 %v2890_v0 }
  0x3b   : > { %1071 = vperm.xlu1 %2825, %v1032_v33  }
  0x3c   : > { %2650 = vmatmul.mubr.msk.f32.gmra.mrb[14].mxu0 %vm328_vm1, %v291_v15  ;;  %2654 = vmatmul.mubr.msk.f32.gmra.mrb[14].mxu1 %vm328_vm1, %v291_v15 }
  0x3d   : > { %1171 = vmatprep.mubr.f32.mxu0 %v2890_v0  ;;  %1290 = vmatprep.mubr.f32.mxu1 %v2890_v0 }
  0x90   : > { %v3089_v30 = vpop.permute.xlu0 %304 }
  0x94   : > { %v3092_v36 = vpop.permute.xlu0 %309 }
  0xf3   : > { %v434_v31 = vpop.f32.mrb[0].mxu0  ;;  %v511_v32 = vpop.f32.mrb[0].mxu1 }
  0xf4   : > { %v436_v34 = vpop.f32.mrb[1].mxu0  ;;  %v513_v35 = vpop.f32.mrb[1].mxu1  ;;  %v435_v37 = vadd.f32 %v434_v31, %v3089_v30  ;;  %v512_v38 = vadd.f32 %v511_v32, %v3089_v30 }
  0xf5   : > { %v437_v39 = vadd.f32 %v436_v34, %v3089_v30  ;;  %v514_v40 = vadd.f32 %v513_v35, %v3089_v30 }
  0xf6   : > { %v984_v49 = vmax.f32 %v435_v37, 0.0  ;;  %v986_v50 = vmax.f32 %v512_v38, 0.0 }
  0xf7   : > { %v440_v41 = vpop.f32.mrb[2].mxu0  ;;  %v517_v42 = vpop.f32.mrb[2].mxu1  ;;  %v985_v53 = vmax.f32 %v437_v39, 0.0  ;;  %v987_v54 = vmax.f32 %v514_v40, 0.0 }
  0xf8   : > { %v441_v43 = vadd.f32 %v440_v41, %v3092_v36  ;;  %v518_v44 = vadd.f32 %v517_v42, %v3092_v36  ;;  %v442_v45 = vpop.f32.mrb[3].mxu0  ;;  %v519_v46 = vpop.f32.mrb[3].mxu1 }
  0xf9   : > { %v443_v47 = vadd.f32 %v442_v45, %v3092_v36  ;;  %v520_v48 = vadd.f32 %v519_v46, %v3092_v36 }
  0xfa   : > { %v1000_v51 = vmax.f32 %v441_v43, 0.0  ;;  %v1002_v52 = vmax.f32 %v518_v44, 0.0  ;;  %v3140_v44 = vld [vmem:[%s3107_s27 + $0x10] sm:$0xff] }
  0xfb   : > { %v1001_v55 = vmax.f32 %v443_v47, 0.0  ;;  %v1003_v56 = vmax.f32 %v520_v48, 0.0  ;;  %v588_v57 = vpop.f32.mrb[4].mxu0  ;;  %v665_v58 = vpop.f32.mrb[4].mxu1 }
  0xfc   : > { %v2733_v59 = vpack.c.bf16 %v1000_v51, %v984_v49  ;;  %v2737_v60 = vpack.c.bf16 %v1002_v52, %v986_v50  ;;  %v590_v61 = vpop.f32.mrb[5].mxu0  ;;  %v667_v62 = vpop.f32.mrb[5].mxu1  ;;  %v589_v2 = vadd.f32 %v588_v57, %v3089_v30  ;;  %v666_v3 = vadd.f32 %v665_v58, %v3089_v30 }
  0xfd   : > { %v2731_v63 = vpack.c.bf16 %v1001_v55, %v985_v53  ;;  %v2735_v1 = vpack.c.bf16 %v1003_v56, %v987_v54  ;;  %v591_v4 = vadd.f32 %v590_v61, %v3089_v30  ;;  %v668_v5 = vadd.f32 %v667_v62, %v3089_v30  ;;  %v3156_v61 = vld [vmem:[%s3107_s27 + $0x18] sm:$0xff] }
  0xfe   : > { %v988_v15 = vmax.f32 %v589_v2, 0.0  ;;  %v990_v16 = vmax.f32 %v666_v3, 0.0 }
  0xff   : > { %v594_v6 = vpop.f32.mrb[6].mxu0  ;;  %v671_v7 = vpop.f32.mrb[6].mxu1  ;;  %2732 = vmatprep.subr.bf16.mxu0 %v2731_v63  ;;  %2736 = vmatprep.subr.bf16.mxu1 %v2735_v1  ;;  %v989_v19 = vmax.f32 %v591_v4, 0.0  ;;  %v991_v20 = vmax.f32 %v668_v5, 0.0 }
 0x100   : > { %v595_v8 = vadd.f32 %v594_v6, %v3092_v36  ;;  %v672_v9 = vadd.f32 %v671_v7, %v3092_v36  ;;  %v596_v10 = vpop.f32.mrb[7].mxu0  ;;  %v673_v11 = vpop.f32.mrb[7].mxu1  ;;  %2734 = vmatpush1.bf16.msra.mxu0 %v2733_v59  ;;  %2738 = vmatpush1.bf16.msra.mxu1 %v2737_v60 }
 0x101   : > { %v597_v13 = vadd.f32 %v596_v10, %v3092_v36  ;;  %v674_v14 = vadd.f32 %v673_v11, %v3092_v36  ;;  %v3170_v11 = vld [vmem:[%s3107_s27 + $0x20] sm:$0xff] }
 0x102   : > { %v1004_v17 = vmax.f32 %v595_v8, 0.0  ;;  %v1006_v18 = vmax.f32 %v672_v9, 0.0 }
 0x103   : > { %v1005_v21 = vmax.f32 %v597_v13, 0.0  ;;  %v1007_v22 = vmax.f32 %v674_v14, 0.0  ;;  %v742_v23 = vpop.f32.mrb[8].mxu0  ;;  %v819_v24 = vpop.f32.mrb[8].mxu1  ;;  %2655 = vmatmul.mubr.msk.f32.vlgmr.msra.gmra.mrb[16].mxu0 %vm1079_vm2, %v3116_v12  ;;  %2664 = vmatmul.mubr.msk.f32.vlgmr.msra.gmra.mrb[16].mxu1 %vm1079_vm2, %v3116_v12 }
 0x104   : > { %v2741_v25 = vpack.c.bf16 %v1004_v17, %v988_v15  ;;  %v2745_v26 = vpack.c.bf16 %v1006_v18, %v990_v16  ;;  %v744_v27 = vpop.f32.mrb[9].mxu0  ;;  %v821_v28 = vpop.f32.mrb[9].mxu1  ;;  %1177 = vmatprep.mubr.f32.mxu0 %v2890_v0  ;;  %1296 = vmatprep.mubr.f32.mxu1 %v2890_v0  ;;  %v743_v33 = vadd.f32 %v742_v23, %v3089_v30  ;;  %v3187_v23 = vld [vmem:[%s3107_s27 + $0x28] sm:$0xff] }
 0x105   : > { %v2739_v31 = vpack.c.bf16 %v1005_v21, %v989_v19  ;;  %v2743_v32 = vpack.c.bf16 %v1007_v22, %v991_v20  ;;  %v820_v34 = vadd.f32 %v819_v24, %v3089_v30  ;;  %v745_v35 = vadd.f32 %v744_v27, %v3089_v30  ;;  %v3205_v27 = vld [vmem:[%s3107_s27 + $0x38] sm:$0xff] }
 0x106   : > { %v822_v37 = vadd.f32 %v821_v28, %v3089_v30  ;;  %v992_v47 = vmax.f32 %v743_v33, 0.0  ;;  %v3214_v28 = vld [vmem:[%s3107_s27 + $0x40] sm:$0xff] }
 0x107   : > { %v748_v38 = vpop.f32.mrb[10].mxu0  ;;  %v825_v39 = vpop.f32.mrb[10].mxu1  ;;  %2656 = vmatmul.mubr.msk.f32.gmra.mrb[18].mxu0 %vm1079_vm2, %v3126_v29  ;;  %2665 = vmatmul.mubr.msk.f32.gmra.mrb[18].mxu1 %vm1079_vm2, %v3126_v29  ;;  %v994_v48 = vmax.f32 %v820_v34, 0.0  ;;  %v993_v51 = vmax.f32 %v745_v35, 0.0 }
 0x108   : > { %v749_v40 = vadd.f32 %v748_v38, %v3092_v36  ;;  %v826_v41 = vadd.f32 %v825_v39, %v3092_v36  ;;  %2740 = vmatprep.subr.bf16.mxu0 %v2739_v31  ;;  %2744 = vmatprep.subr.bf16.mxu1 %v2743_v32  ;;  %v750_v42 = vpop.f32.mrb[11].mxu0  ;;  %v827_v43 = vpop.f32.mrb[11].mxu1  ;;  %v995_v52 = vmax.f32 %v822_v37, 0.0 }
 0x109   : > { %v751_v45 = vadd.f32 %v750_v42, %v3092_v36  ;;  %v828_v46 = vadd.f32 %v827_v43, %v3092_v36  ;;  %2742 = vmatpush1.bf16.msra.mxu0 %v2741_v25  ;;  %2746 = vmatpush1.bf16.msra.mxu1 %v2745_v26  ;;  %v3196_v26 = vld [vmem:[%s3107_s27 + $0x30] sm:$0xff] }
 0x10a   : > { %v1008_v49 = vmax.f32 %v749_v40, 0.0  ;;  %v1010_v50 = vmax.f32 %v826_v41, 0.0  ;;  %1183 = vmatprep.mubr.f32.mxu0 %v2890_v0  ;;  %1302 = vmatprep.mubr.f32.mxu1 %v2890_v0 }
 0x10b   : > { %v1009_v53 = vmax.f32 %v751_v45, 0.0  ;;  %v1011_v54 = vmax.f32 %v828_v46, 0.0  ;;  %v896_v55 = vpop.f32.mrb[12].mxu0  ;;  %v973_v56 = vpop.f32.mrb[12].mxu1  ;;  %2657 = vmatmul.mubr.msk.f32.gmra.mrb[20].mxu0 %vm1079_vm2, %v3140_v44  ;;  %2666 = vmatmul.mubr.msk.f32.gmra.mrb[20].mxu1 %vm1079_vm2, %v3140_v44 }
 0x10c   : > { %v3150_v57 = vpack.c.bf16 %v1008_v49, %v992_v47  ;;  %v3152_v58 = vpack.c.bf16 %v1010_v50, %v994_v48  ;;  %v898_v59 = vpop.f32.mrb[13].mxu0  ;;  %v975_v60 = vpop.f32.mrb[13].mxu1  ;;  %1189 = vmatprep.mubr.f32.mxu0 %v2890_v0  ;;  %1308 = vmatprep.mubr.f32.mxu1 %v2890_v0  ;;  %v897_v1 = vadd.f32 %v896_v55, %v3089_v30 }
 0x10d   : > { %v2747_v62 = vpack.c.bf16 %v1009_v53, %v993_v51  ;;  %v2751_v63 = vpack.c.bf16 %v1011_v54, %v995_v52  ;;  %v974_v2 = vadd.f32 %v973_v56, %v3089_v30  ;;  %v899_v3 = vadd.f32 %v898_v59, %v3089_v30  ;;  %v3405_v47 = vpop.permute.xlu0 %1046 }
 0x10e   : > { %v976_v4 = vadd.f32 %v975_v60, %v3089_v30  ;;  %v996_v14 = vmax.f32 %v897_v1, 0.0 }
 0x10f   : > { %v902_v5 = vpop.f32.mrb[14].mxu0  ;;  %v979_v6 = vpop.f32.mrb[14].mxu1  ;;  %2658 = vmatmul.mubr.msk.f32.gmra.mrb[22].mxu0 %vm1079_vm2, %v3156_v61  ;;  %2667 = vmatmul.mubr.msk.f32.gmra.mrb[22].mxu1 %vm1079_vm2, %v3156_v61  ;;  %v998_v15 = vmax.f32 %v974_v2, 0.0  ;;  %v997_v18 = vmax.f32 %v899_v3, 0.0 }
 0x110   : > { %v903_v7 = vadd.f32 %v902_v5, %v3092_v36  ;;  %v980_v8 = vadd.f32 %v979_v6, %v3092_v36  ;;  %2748 = vmatprep.subr.bf16.mxu0 %v2747_v62  ;;  %2752 = vmatprep.subr.bf16.mxu1 %v2751_v63  ;;  %v904_v9 = vpop.f32.mrb[15].mxu0  ;;  %v981_v10 = vpop.f32.mrb[15].mxu1  ;;  %v999_v19 = vmax.f32 %v976_v4, 0.0 }
 0x111   : > { %v905_v30 = vadd.f32 %v904_v9, %v3092_v36  ;;  %v982_v13 = vadd.f32 %v981_v10, %v3092_v36  ;;  %1195 = vmatprep.mubr.f32.mxu0 %v2890_v0  ;;  %1314 = vmatprep.mubr.f32.mxu1 %v2890_v0  ;;  %v3425_v2 = vpop.permute.xlu0 %1056 }
 0x112   : > { %v1012_v16 = vmax.f32 %v903_v7, 0.0  ;;  %v1014_v17 = vmax.f32 %v980_v8, 0.0 }
 0x113   : > { %v1013_v20 = vmax.f32 %v905_v30, 0.0  ;;  %v1015_v21 = vmax.f32 %v982_v13, 0.0  ;;  %2659 = vmatmul.mubr.msk.f32.gmra.mrb[24].mxu0 %vm1079_vm2, %v3170_v11  ;;  %2668 = vmatmul.mubr.msk.f32.gmra.mrb[24].mxu1 %vm1079_vm2, %v3170_v11 }
 0x114   : > { %v3180_v36 = vpack.c.bf16 %v1012_v16, %v996_v14  ;;  %v3182_v22 = vpack.c.bf16 %v1014_v17, %v998_v15  ;;  %1201 = vmatprep.mubr.f32.mxu0 %v2890_v0  ;;  %1320 = vmatprep.mubr.f32.mxu1 %v2890_v0 }
 0x115   : > { %v2755_v24 = vpack.c.bf16 %v1013_v20, %v997_v18  ;;  %v2759_v25 = vpack.c.bf16 %v1015_v21, %v999_v19  ;;  %v3445_v20 = vpop.permute.xlu0 %1066 }
 0x117   : > { %2660 = vmatmul.mubr.msk.f32.gmra.mrb[26].mxu0 %vm1079_vm2, %v3187_v23  ;;  %2669 = vmatmul.mubr.msk.f32.gmra.mrb[26].mxu1 %vm1079_vm2, %v3187_v23 }
 0x118   : > { %1207 = vmatprep.mubr.f32.mxu0 %v2890_v0  ;;  %1326 = vmatprep.mubr.f32.mxu1 %v2890_v0 }
 0x11b   : > { %2661 = vmatmul.mubr.msk.f32.gmra.mrb[28].mxu0 %vm1079_vm2, %v3196_v26  ;;  %2670 = vmatmul.mubr.msk.f32.gmra.mrb[28].mxu1 %vm1079_vm2, %v3196_v26 }
 0x11c   : > { %1213 = vmatprep.mubr.f32.mxu0 %v2890_v0  ;;  %1332 = vmatprep.mubr.f32.mxu1 %v2890_v0 }
 0x11f   : > { %2662 = vmatmul.mubr.msk.f32.gmra.mrb[30].mxu0 %vm1079_vm2, %v3205_v27  ;;  %2671 = vmatmul.mubr.msk.f32.gmra.mrb[30].mxu1 %vm1079_vm2, %v3205_v27 }
 0x120   : > { %1219 = vmatprep.mubr.f32.mxu0 %v2890_v0  ;;  %1338 = vmatprep.mubr.f32.mxu1 %v2890_v0 }
 0x123   : > { %2663 = vmatmul.mubr.msk.f32.gmra.mrb[32].mxu0 %vm1079_vm2, %v3214_v28  ;;  %2672 = vmatmul.mubr.msk.f32.gmra.mrb[32].mxu1 %vm1079_vm2, %v3214_v28 }
 0x124   : > { %1409 = vmatprep.mubr.f32.mxu0 %v2890_v0  ;;  %1528 = vmatprep.mubr.f32.mxu1 %v2890_v0 }
 0x127   : > { %2673 = vmatmul.mubr.msk.f32.vlgmr.msra.gmra.mrb[34].mxu0 %vm1079_vm2, %v3116_v12  ;;  %2682 = vmatmul.mubr.msk.f32.vlgmr.msra.gmra.mrb[34].mxu1 %vm1079_vm2, %v3116_v12 }
 0x128   : > { %2750 = vmatpush1.bf16.msra.mxu0 %v3150_v57  ;;  %2754 = vmatpush1.bf16.msra.mxu1 %v3152_v58 }
 0x129   : > { %2756 = vmatprep.subr.bf16.mxu0 %v2755_v24  ;;  %2760 = vmatprep.subr.bf16.mxu1 %v2759_v25 }
 0x12a   : > { %1415 = vmatprep.mubr.f32.mxu0 %v2890_v0  ;;  %1534 = vmatprep.mubr.f32.mxu1 %v2890_v0 }
 0x12b   : > { %2674 = vmatmul.mubr.msk.f32.gmra.mrb[36].mxu0 %vm1079_vm2, %v3126_v29  ;;  %2683 = vmatmul.mubr.msk.f32.gmra.mrb[36].mxu1 %vm1079_vm2, %v3126_v29 }
 0x12c   : > { %1421 = vmatprep.mubr.f32.mxu0 %v2890_v0  ;;  %1540 = vmatprep.mubr.f32.mxu1 %v2890_v0 }
 0x12f   : > { %2675 = vmatmul.mubr.msk.f32.gmra.mrb[38].mxu0 %vm1079_vm2, %v3140_v44  ;;  %2684 = vmatmul.mubr.msk.f32.gmra.mrb[38].mxu1 %vm1079_vm2, %v3140_v44 }
 0x130   : > { %1427 = vmatprep.mubr.f32.mxu0 %v2890_v0  ;;  %1546 = vmatprep.mubr.f32.mxu1 %v2890_v0 }
 0x133   : > { %2676 = vmatmul.mubr.msk.f32.gmra.mrb[40].mxu0 %vm1079_vm2, %v3156_v61  ;;  %2685 = vmatmul.mubr.msk.f32.gmra.mrb[40].mxu1 %vm1079_vm2, %v3156_v61 }
 0x134   : > { %1433 = vmatprep.mubr.f32.mxu0 %v2890_v0  ;;  %1552 = vmatprep.mubr.f32.mxu1 %v2890_v0 }
 0x137   : > { %2677 = vmatmul.mubr.msk.f32.gmra.mrb[42].mxu0 %vm1079_vm2, %v3170_v11  ;;  %2686 = vmatmul.mubr.msk.f32.gmra.mrb[42].mxu1 %vm1079_vm2, %v3170_v11 }
 0x138   : > { %1439 = vmatprep.mubr.f32.mxu0 %v2890_v0  ;;  %1558 = vmatprep.mubr.f32.mxu1 %v2890_v0 }
 0x13b   : > { %2678 = vmatmul.mubr.msk.f32.gmra.mrb[44].mxu0 %vm1079_vm2, %v3187_v23  ;;  %2687 = vmatmul.mubr.msk.f32.gmra.mrb[44].mxu1 %vm1079_vm2, %v3187_v23 }
 0x13c   : > { %1445 = vmatprep.mubr.f32.mxu0 %v2890_v0  ;;  %1564 = vmatprep.mubr.f32.mxu1 %v2890_v0 }
 0x13f   : > { %2679 = vmatmul.mubr.msk.f32.gmra.mrb[46].mxu0 %vm1079_vm2, %v3196_v26  ;;  %2688 = vmatmul.mubr.msk.f32.gmra.mrb[46].mxu1 %vm1079_vm2, %v3196_v26 }
 0x140   : > { %1451 = vmatprep.mubr.f32.mxu0 %v2890_v0  ;;  %1570 = vmatprep.mubr.f32.mxu1 %v2890_v0 }
 0x143   : > { %2680 = vmatmul.mubr.msk.f32.gmra.mrb[48].mxu0 %vm1079_vm2, %v3205_v27  ;;  %2689 = vmatmul.mubr.msk.f32.gmra.mrb[48].mxu1 %vm1079_vm2, %v3205_v27 }
 0x144   : > { %1457 = vmatprep.mubr.f32.mxu0 %v2890_v0  ;;  %1576 = vmatprep.mubr.f32.mxu1 %v2890_v0 }
 0x147   : > { %2681 = vmatmul.mubr.msk.f32.gmra.mrb[50].mxu0 %vm1079_vm2, %v3214_v28  ;;  %2690 = vmatmul.mubr.msk.f32.gmra.mrb[50].mxu1 %vm1079_vm2, %v3214_v28 }
 0x148   : > { %1647 = vmatprep.mubr.f32.mxu0 %v2890_v0  ;;  %1766 = vmatprep.mubr.f32.mxu1 %v2890_v0 }
 0x14b   : > { %2691 = vmatmul.mubr.msk.f32.vlgmr.msra.gmra.mrb[52].mxu0 %vm1079_vm2, %v3116_v12  ;;  %2700 = vmatmul.mubr.msk.f32.vlgmr.msra.gmra.mrb[52].mxu1 %vm1079_vm2, %v3116_v12 }
 0x14c   : > { %2758 = vmatpush1.bf16.msra.mxu0 %v3180_v36  ;;  %2762 = vmatpush1.bf16.msra.mxu1 %v3182_v22 }
 0x14d   : > { %1653 = vmatprep.mubr.f32.mxu0 %v2890_v0  ;;  %1772 = vmatprep.mubr.f32.mxu1 %v2890_v0 }
 0x14f   : > { %2692 = vmatmul.mubr.msk.f32.gmra.mrb[54].mxu0 %vm1079_vm2, %v3126_v29  ;;  %2701 = vmatmul.mubr.msk.f32.gmra.mrb[54].mxu1 %vm1079_vm2, %v3126_v29 }
 0x150   : > { %1659 = vmatprep.mubr.f32.mxu0 %v2890_v0  ;;  %1778 = vmatprep.mubr.f32.mxu1 %v2890_v0 }
 0x153   : > { %2693 = vmatmul.mubr.msk.f32.gmra.mrb[56].mxu0 %vm1079_vm2, %v3140_v44  ;;  %2702 = vmatmul.mubr.msk.f32.gmra.mrb[56].mxu1 %vm1079_vm2, %v3140_v44 }
 0x154   : > { %1665 = vmatprep.mubr.f32.mxu0 %v2890_v0  ;;  %1784 = vmatprep.mubr.f32.mxu1 %v2890_v0 }
 0x157   : > { %2694 = vmatmul.mubr.msk.f32.gmra.mrb[58].mxu0 %vm1079_vm2, %v3156_v61  ;;  %2703 = vmatmul.mubr.msk.f32.gmra.mrb[58].mxu1 %vm1079_vm2, %v3156_v61 }
 0x158   : > { %1671 = vmatprep.mubr.f32.mxu0 %v2890_v0  ;;  %1790 = vmatprep.mubr.f32.mxu1 %v2890_v0 }
 0x15b   : > { %2695 = vmatmul.mubr.msk.f32.gmra.mrb[60].mxu0 %vm1079_vm2, %v3170_v11  ;;  %2704 = vmatmul.mubr.msk.f32.gmra.mrb[60].mxu1 %vm1079_vm2, %v3170_v11 }
 0x15c   : > { %1677 = vmatprep.mubr.f32.mxu0 %v2890_v0  ;;  %1796 = vmatprep.mubr.f32.mxu1 %v2890_v0 }
 0x15f   : > { %2696 = vmatmul.mubr.msk.f32.gmra.mrb[62].mxu0 %vm1079_vm2, %v3187_v23  ;;  %2705 = vmatmul.mubr.msk.f32.gmra.mrb[62].mxu1 %vm1079_vm2, %v3187_v23 }
 0x160   : > { %1683 = vmatprep.mubr.f32.mxu0 %v2890_v0  ;;  %1802 = vmatprep.mubr.f32.mxu1 %v2890_v0 }
 0x163   : > { %2697 = vmatmul.mubr.msk.f32.gmra.mrb[64].mxu0 %vm1079_vm2, %v3196_v26  ;;  %2706 = vmatmul.mubr.msk.f32.gmra.mrb[64].mxu1 %vm1079_vm2, %v3196_v26 }
 0x164   : > { %1689 = vmatprep.mubr.f32.mxu0 %v2890_v0  ;;  %1808 = vmatprep.mubr.f32.mxu1 %v2890_v0 }
 0x167   : > { %2698 = vmatmul.mubr.msk.f32.gmra.mrb[66].mxu0 %vm1079_vm2, %v3205_v27  ;;  %2707 = vmatmul.mubr.msk.f32.gmra.mrb[66].mxu1 %vm1079_vm2, %v3205_v27 }
 0x168   : > { %1695 = vmatprep.mubr.f32.mxu0 %v2890_v0  ;;  %1814 = vmatprep.mubr.f32.mxu1 %v2890_v0 }
 0x16b   : > { %2699 = vmatmul.mubr.msk.f32.gmra.mrb[68].mxu0 %vm1079_vm2, %v3214_v28  ;;  %2708 = vmatmul.mubr.msk.f32.gmra.mrb[68].mxu1 %vm1079_vm2, %v3214_v28 }
 0x16c   : > { %1885 = vmatprep.mubr.f32.mxu0 %v2890_v0  ;;  %2004 = vmatprep.mubr.f32.mxu1 %v2890_v0 }
 0x16f   : > { %2709 = vmatmul.mubr.msk.f32.vlgmr.msra.gmra.mrb[70].mxu0 %vm1079_vm2, %v3116_v12  ;;  %2718 = vmatmul.mubr.msk.f32.vlgmr.msra.gmra.mrb[70].mxu1 %vm1079_vm2, %v3116_v12  ;;  %v3387_v12 = vpop.permute.xlu1 %1036 }
 0x170   : > { %1891 = vmatprep.mubr.f32.mxu0 %v2890_v0  ;;  %2010 = vmatprep.mubr.f32.mxu1 %v2890_v0 }
 0x173   : > { %2710 = vmatmul.mubr.msk.f32.gmra.mrb[72].mxu0 %vm1079_vm2, %v3126_v29  ;;  %2719 = vmatmul.mubr.msk.f32.gmra.mrb[72].mxu1 %vm1079_vm2, %v3126_v29  ;;  %v3393_v38 = vpop.permute.xlu1 %1041 }
 0x174   : > { %1897 = vmatprep.mubr.f32.mxu0 %v2890_v0  ;;  %2016 = vmatprep.mubr.f32.mxu1 %v2890_v0 }
 0x177   : > { %2711 = vmatmul.mubr.msk.f32.gmra.mrb[74].mxu0 %vm1079_vm2, %v3140_v44  ;;  %2720 = vmatmul.mubr.msk.f32.gmra.mrb[74].mxu1 %vm1079_vm2, %v3140_v44  ;;  %v3415_v56 = vpop.permute.xlu1 %1051 }
 0x178   : > { %1903 = vmatprep.mubr.f32.mxu0 %v2890_v0  ;;  %2022 = vmatprep.mubr.f32.mxu1 %v2890_v0 }
 0x17b   : > { %2712 = vmatmul.mubr.msk.f32.gmra.mrb[76].mxu0 %vm1079_vm2, %v3156_v61  ;;  %2721 = vmatmul.mubr.msk.f32.gmra.mrb[76].mxu1 %vm1079_vm2, %v3156_v61 }
 0x17c   : > { %1909 = vmatprep.mubr.f32.mxu0 %v2890_v0  ;;  %2028 = vmatprep.mubr.f32.mxu1 %v2890_v0 }
 0x17f   : > { %2713 = vmatmul.mubr.msk.f32.gmra.mrb[78].mxu0 %vm1079_vm2, %v3170_v11  ;;  %2722 = vmatmul.mubr.msk.f32.gmra.mrb[78].mxu1 %vm1079_vm2, %v3170_v11  ;;  %v3435_v11 = vpop.permute.xlu1 %1061 }
 0x180   : > { %1915 = vmatprep.mubr.f32.mxu0 %v2890_v0  ;;  %2034 = vmatprep.mubr.f32.mxu1 %v2890_v0 }
 0x183   : > { %2714 = vmatmul.mubr.msk.f32.gmra.mrb[80].mxu0 %vm1079_vm2, %v3187_v23  ;;  %2723 = vmatmul.mubr.msk.f32.gmra.mrb[80].mxu1 %vm1079_vm2, %v3187_v23 }
 0x184   : > { %1921 = vmatprep.mubr.f32.mxu0 %v2890_v0  ;;  %2040 = vmatprep.mubr.f32.mxu1 %v2890_v0 }
 0x187   : > { %2715 = vmatmul.mubr.msk.f32.gmra.mrb[82].mxu0 %vm1079_vm2, %v3196_v26  ;;  %2724 = vmatmul.mubr.msk.f32.gmra.mrb[82].mxu1 %vm1079_vm2, %v3196_v26 }
 0x188   : > { %1927 = vmatprep.mubr.f32.mxu0 %v2890_v0  ;;  %2046 = vmatprep.mubr.f32.mxu1 %v2890_v0 }
 0x18b   : > { %2716 = vmatmul.mubr.msk.f32.gmra.mrb[84].mxu0 %vm1079_vm2, %v3205_v27  ;;  %2725 = vmatmul.mubr.msk.f32.gmra.mrb[84].mxu1 %vm1079_vm2, %v3205_v27 }
 0x18c   : > { %1933 = vmatprep.mubr.f32.mxu0 %v2890_v0  ;;  %2052 = vmatprep.mubr.f32.mxu1 %v2890_v0 }
 0x18f   : > { %2717 = vmatmul.mubr.msk.f32.gmra.mrb[86].mxu0 %vm1079_vm2, %v3214_v28  ;;  %2726 = vmatmul.mubr.msk.f32.gmra.mrb[86].mxu1 %vm1079_vm2, %v3214_v28  ;;  %v3455_v28 = vpop.permute.xlu1 %1071 }
 0x1d6   : > { %v1173_v29 = vpop.f32.mrb[16].mxu0  ;;  %v1292_v31 = vpop.f32.mrb[16].mxu1 }
 0x1d7   : > { %v1174_v32 = vadd.f32 %v1173_v29, %v3387_v12  ;;  %v1293_v33 = vadd.f32 %v1292_v31, %v3387_v12  ;;  %v1175_v34 = vpop.f32.mrb[17].mxu0  ;;  %v1294_v35 = vpop.f32.mrb[17].mxu1 }
 0x1d8   : > { %v1176_v0 = vadd.f32 %v1175_v34, %v3387_v12  ;;  %v1295_v37 = vadd.f32 %v1294_v35, %v3387_v12 }
 0x1d9   : > { %2059 = vst [vmem:[%s3395_s30] sm:$0xff] %v1174_v32  ;;  %2061 = vst [vmem:[%s3395_s30 + $0x10] sm:$0xff] %v1293_v33 }
 0x1da   : > { %2060 = vst [vmem:[%s3395_s30 + $0x8] sm:$0xff] %v1176_v0  ;;  %2062 = vst [vmem:[%s3395_s30 + $0x18] sm:$0xff] %v1295_v37  ;;  %v1179_v39 = vpop.f32.mrb[18].mxu0  ;;  %v1298_v40 = vpop.f32.mrb[18].mxu1 }
 0x1db   : > { %v1181_v41 = vpop.f32.mrb[19].mxu0  ;;  %v1300_v42 = vpop.f32.mrb[19].mxu1  ;;  %v1180_v43 = vadd.f32 %v1179_v39, %v3393_v38  ;;  %v1299_v44 = vadd.f32 %v1298_v40, %v3393_v38 }
 0x1dc   : > { %v1182_v45 = vadd.f32 %v1181_v41, %v3393_v38  ;;  %v1301_v46 = vadd.f32 %v1300_v42, %v3393_v38  ;;  %v3465_v39 = vpop.permute.xlu0 %1076 }
 0x1dd   : > { %2075 = vst [vmem:[%s3395_s30 + $0x80] sm:$0xff] %v1180_v43  ;;  %2077 = vst [vmem:[%s3395_s30 + $0x90] sm:$0xff] %v1299_v44 }
 0x1de   : > { %v1185_v48 = vpop.f32.mrb[20].mxu0  ;;  %v1304_v49 = vpop.f32.mrb[20].mxu1  ;;  %2076 = vst [vmem:[%s3395_s30 + $0x88] sm:$0xff] %v1182_v45  ;;  %2078 = vst [vmem:[%s3395_s30 + $0x98] sm:$0xff] %v1301_v46 }
 0x1df   : > { %v1186_v50 = vadd.f32 %v1185_v48, %v3405_v47  ;;  %v1305_v51 = vadd.f32 %v1304_v49, %v3405_v47  ;;  %v1187_v52 = vpop.f32.mrb[21].mxu0  ;;  %v1306_v53 = vpop.f32.mrb[21].mxu1 }
 0x1e0   : > { %v1188_v54 = vadd.f32 %v1187_v52, %v3405_v47  ;;  %v1307_v55 = vadd.f32 %v1306_v53, %v3405_v47 }
 0x1e1   : > { %2091 = vst [vmem:[%s3395_s30 + $0x100] sm:$0xff] %v1186_v50  ;;  %2093 = vst [vmem:[%s3395_s30 + $0x110] sm:$0xff] %v1305_v51 }
 0x1e2   : > { %2092 = vst [vmem:[%s3395_s30 + $0x108] sm:$0xff] %v1188_v54  ;;  %2094 = vst [vmem:[%s3395_s30 + $0x118] sm:$0xff] %v1307_v55  ;;  %v1191_v57 = vpop.f32.mrb[22].mxu0  ;;  %v1310_v58 = vpop.f32.mrb[22].mxu1 }
 0x1e3   : > { %v1193_v59 = vpop.f32.mrb[23].mxu0  ;;  %v1312_v60 = vpop.f32.mrb[23].mxu1  ;;  %v1192_v61 = vadd.f32 %v1191_v57, %v3415_v56  ;;  %v1311_v62 = vadd.f32 %v1310_v58, %v3415_v56 }
 0x1e4   : > { %v1194_v63 = vadd.f32 %v1193_v59, %v3415_v56  ;;  %v1313_v1 = vadd.f32 %v1312_v60, %v3415_v56 }
 0x1e5   : > { %2107 = vst [vmem:[%s3395_s30 + $0x180] sm:$0xff] %v1192_v61  ;;  %2109 = vst [vmem:[%s3395_s30 + $0x190] sm:$0xff] %v1311_v62 }
 0x1e6   : > { %v1197_v3 = vpop.f32.mrb[24].mxu0  ;;  %v1316_v4 = vpop.f32.mrb[24].mxu1  ;;  %2108 = vst [vmem:[%s3395_s30 + $0x188] sm:$0xff] %v1194_v63  ;;  %2110 = vst [vmem:[%s3395_s30 + $0x198] sm:$0xff] %v1313_v1 }
 0x1e7   : > { %v1198_v5 = vadd.f32 %v1197_v3, %v3425_v2  ;;  %v1317_v6 = vadd.f32 %v1316_v4, %v3425_v2  ;;  %v1199_v7 = vpop.f32.mrb[25].mxu0  ;;  %v1318_v8 = vpop.f32.mrb[25].mxu1 }
 0x1e8   : > { %v1200_v9 = vadd.f32 %v1199_v7, %v3425_v2  ;;  %v1319_v10 = vadd.f32 %v1318_v8, %v3425_v2 }
 0x1e9   : > { %2123 = vst [vmem:[%s3395_s30 + $0x200] sm:$0xff] %v1198_v5  ;;  %2125 = vst [vmem:[%s3395_s30 + $0x210] sm:$0xff] %v1317_v6 }
 0x1ea   : > { %2124 = vst [vmem:[%s3395_s30 + $0x208] sm:$0xff] %v1200_v9  ;;  %2126 = vst [vmem:[%s3395_s30 + $0x218] sm:$0xff] %v1319_v10  ;;  %v1203_v30 = vpop.f32.mrb[26].mxu0  ;;  %v1322_v13 = vpop.f32.mrb[26].mxu1 }
 0x1eb   : > { %v1205_v14 = vpop.f32.mrb[27].mxu0  ;;  %v1324_v15 = vpop.f32.mrb[27].mxu1  ;;  %v1204_v16 = vadd.f32 %v1203_v30, %v3435_v11  ;;  %v1323_v17 = vadd.f32 %v1322_v13, %v3435_v11 }
 0x1ec   : > { %v1206_v18 = vadd.f32 %v1205_v14, %v3435_v11  ;;  %v1325_v19 = vadd.f32 %v1324_v15, %v3435_v11 }
 0x1ed   : > { %2139 = vst [vmem:[%s3395_s30 + $0x280] sm:$0xff] %v1204_v16  ;;  %2141 = vst [vmem:[%s3395_s30 + $0x290] sm:$0xff] %v1323_v17 }
 0x1ee   : > { %v1209_v21 = vpop.f32.mrb[28].mxu0  ;;  %v1328_v36 = vpop.f32.mrb[28].mxu1  ;;  %2140 = vst [vmem:[%s3395_s30 + $0x288] sm:$0xff] %v1206_v18  ;;  %2142 = vst [vmem:[%s3395_s30 + $0x298] sm:$0xff] %v1325_v19 }
 0x1ef   : > { %v1210_v22 = vadd.f32 %v1209_v21, %v3445_v20  ;;  %v1329_v23 = vadd.f32 %v1328_v36, %v3445_v20  ;;  %v1211_v24 = vpop.f32.mrb[29].mxu0  ;;  %v1330_v25 = vpop.f32.mrb[29].mxu1 }
 0x1f0   : > { %v1212_v26 = vadd.f32 %v1211_v24, %v3445_v20  ;;  %v1331_v27 = vadd.f32 %v1330_v25, %v3445_v20 }
 0x1f1   : > { %2155 = vst [vmem:[%s3395_s30 + $0x300] sm:$0xff] %v1210_v22  ;;  %2157 = vst [vmem:[%s3395_s30 + $0x310] sm:$0xff] %v1329_v23 }
 0x1f2   : > { %2156 = vst [vmem:[%s3395_s30 + $0x308] sm:$0xff] %v1212_v26  ;;  %2158 = vst [vmem:[%s3395_s30 + $0x318] sm:$0xff] %v1331_v27  ;;  %v1215_v29 = vpop.f32.mrb[30].mxu0  ;;  %v1334_v31 = vpop.f32.mrb[30].mxu1 }
 0x1f3   : > { %v1217_v32 = vpop.f32.mrb[31].mxu0  ;;  %v1336_v33 = vpop.f32.mrb[31].mxu1  ;;  %v1216_v34 = vadd.f32 %v1215_v29, %v3455_v28  ;;  %v1335_v35 = vadd.f32 %v1334_v31, %v3455_v28 }
 0x1f4   : > { %v1218_v0 = vadd.f32 %v1217_v32, %v3455_v28  ;;  %v1337_v37 = vadd.f32 %v1336_v33, %v3455_v28 }
 0x1f5   : > { %2171 = vst [vmem:[%s3395_s30 + $0x380] sm:$0xff] %v1216_v34  ;;  %2173 = vst [vmem:[%s3395_s30 + $0x390] sm:$0xff] %v1335_v35 }
 0x1f6   : > { %v1221_v40 = vpop.f32.mrb[32].mxu0  ;;  %v1340_v41 = vpop.f32.mrb[32].mxu1  ;;  %2172 = vst [vmem:[%s3395_s30 + $0x388] sm:$0xff] %v1218_v0  ;;  %2174 = vst [vmem:[%s3395_s30 + $0x398] sm:$0xff] %v1337_v37 }
 0x1f7   : > { %v1222_v42 = vadd.f32 %v1221_v40, %v3465_v39  ;;  %v1341_v43 = vadd.f32 %v1340_v41, %v3465_v39  ;;  %v1223_v44 = vpop.f32.mrb[33].mxu0  ;;  %v1342_v45 = vpop.f32.mrb[33].mxu1 }
 0x1f8   : > { %v1224_v46 = vadd.f32 %v1223_v44, %v3465_v39  ;;  %v1343_v48 = vadd.f32 %v1342_v45, %v3465_v39 }
 0x1f9   : > { %2187 = vst [vmem:[%s3395_s30 + $0x400] sm:$0xff] %v1222_v42  ;;  %2189 = vst [vmem:[%s3395_s30 + $0x410] sm:$0xff] %v1341_v43 }
 0x1fa   : > { %2188 = vst [vmem:[%s3395_s30 + $0x408] sm:$0xff] %v1224_v46  ;;  %2190 = vst [vmem:[%s3395_s30 + $0x418] sm:$0xff] %v1343_v48  ;;  %v1411_v49 = vpop.f32.mrb[34].mxu0  ;;  %v1530_v50 = vpop.f32.mrb[34].mxu1 }
 0x1fb   : > { %v1412_v51 = vadd.f32 %v1411_v49, %v3387_v12  ;;  %v1531_v52 = vadd.f32 %v1530_v50, %v3387_v12  ;;  %v1413_v53 = vpop.f32.mrb[35].mxu0  ;;  %v1532_v54 = vpop.f32.mrb[35].mxu1 }
 0x1fc   : > { %v1414_v55 = vadd.f32 %v1413_v53, %v3387_v12  ;;  %v1533_v57 = vadd.f32 %v1532_v54, %v3387_v12 }
 0x1fd   : > { %2063 = vst [vmem:[%s3395_s30 + $0x20] sm:$0xff] %v1412_v51  ;;  %2065 = vst [vmem:[%s3395_s30 + $0x30] sm:$0xff] %v1531_v52 }
 0x1fe   : > { %2064 = vst [vmem:[%s3395_s30 + $0x28] sm:$0xff] %v1414_v55  ;;  %2066 = vst [vmem:[%s3395_s30 + $0x38] sm:$0xff] %v1533_v57  ;;  %v1417_v58 = vpop.f32.mrb[36].mxu0  ;;  %v1536_v59 = vpop.f32.mrb[36].mxu1 }
 0x1ff   : > { %v1418_v60 = vadd.f32 %v1417_v58, %v3393_v38  ;;  %v1537_v61 = vadd.f32 %v1536_v59, %v3393_v38  ;;  %v1419_v62 = vpop.f32.mrb[37].mxu0  ;;  %v1538_v63 = vpop.f32.mrb[37].mxu1 }
 0x200   : > { %v1420_v1 = vadd.f32 %v1419_v62, %v3393_v38  ;;  %v1539_v3 = vadd.f32 %v1538_v63, %v3393_v38 }
 0x201   : > { %2079 = vst [vmem:[%s3395_s30 + $0xa0] sm:$0xff] %v1418_v60  ;;  %2081 = vst [vmem:[%s3395_s30 + $0xb0] sm:$0xff] %v1537_v61 }
 0x202   : > { %2080 = vst [vmem:[%s3395_s30 + $0xa8] sm:$0xff] %v1420_v1  ;;  %2082 = vst [vmem:[%s3395_s30 + $0xb8] sm:$0xff] %v1539_v3  ;;  %v1423_v4 = vpop.f32.mrb[38].mxu0  ;;  %v1542_v5 = vpop.f32.mrb[38].mxu1 }
 0x203   : > { %v1424_v6 = vadd.f32 %v1423_v4, %v3405_v47  ;;  %v1543_v7 = vadd.f32 %v1542_v5, %v3405_v47  ;;  %v1425_v8 = vpop.f32.mrb[39].mxu0  ;;  %v1544_v9 = vpop.f32.mrb[39].mxu1 }
 0x204   : > { %v1426_v10 = vadd.f32 %v1425_v8, %v3405_v47  ;;  %v1545_v30 = vadd.f32 %v1544_v9, %v3405_v47 }
 0x205   : > { %2095 = vst [vmem:[%s3395_s30 + $0x120] sm:$0xff] %v1424_v6  ;;  %2097 = vst [vmem:[%s3395_s30 + $0x130] sm:$0xff] %v1543_v7 }
 0x206   : > { %2096 = vst [vmem:[%s3395_s30 + $0x128] sm:$0xff] %v1426_v10  ;;  %2098 = vst [vmem:[%s3395_s30 + $0x138] sm:$0xff] %v1545_v30  ;;  %v1429_v13 = vpop.f32.mrb[40].mxu0  ;;  %v1548_v14 = vpop.f32.mrb[40].mxu1 }
 0x207   : > { %v1430_v15 = vadd.f32 %v1429_v13, %v3415_v56  ;;  %v1549_v16 = vadd.f32 %v1548_v14, %v3415_v56  ;;  %v1431_v17 = vpop.f32.mrb[41].mxu0  ;;  %v1550_v18 = vpop.f32.mrb[41].mxu1 }
 0x208   : > { %v1432_v19 = vadd.f32 %v1431_v17, %v3415_v56  ;;  %v1551_v21 = vadd.f32 %v1550_v18, %v3415_v56 }
 0x209   : > { %2111 = vst [vmem:[%s3395_s30 + $0x1a0] sm:$0xff] %v1430_v15  ;;  %2113 = vst [vmem:[%s3395_s30 + $0x1b0] sm:$0xff] %v1549_v16 }
 0x20a   : > { %2112 = vst [vmem:[%s3395_s30 + $0x1a8] sm:$0xff] %v1432_v19  ;;  %2114 = vst [vmem:[%s3395_s30 + $0x1b8] sm:$0xff] %v1551_v21  ;;  %v1435_v36 = vpop.f32.mrb[42].mxu0  ;;  %v1554_v22 = vpop.f32.mrb[42].mxu1 }
 0x20b   : > { %v1436_v23 = vadd.f32 %v1435_v36, %v3425_v2  ;;  %v1555_v24 = vadd.f32 %v1554_v22, %v3425_v2  ;;  %v1437_v25 = vpop.f32.mrb[43].mxu0  ;;  %v1556_v26 = vpop.f32.mrb[43].mxu1 }
 0x20c   : > { %v1438_v27 = vadd.f32 %v1437_v25, %v3425_v2  ;;  %v1557_v29 = vadd.f32 %v1556_v26, %v3425_v2 }
 0x20d   : > { %2127 = vst [vmem:[%s3395_s30 + $0x220] sm:$0xff] %v1436_v23  ;;  %2129 = vst [vmem:[%s3395_s30 + $0x230] sm:$0xff] %v1555_v24 }
 0x20e   : > { %2128 = vst [vmem:[%s3395_s30 + $0x228] sm:$0xff] %v1438_v27  ;;  %2130 = vst [vmem:[%s3395_s30 + $0x238] sm:$0xff] %v1557_v29  ;;  %v1441_v31 = vpop.f32.mrb[44].mxu0  ;;  %v1560_v32 = vpop.f32.mrb[44].mxu1 }
 0x20f   : > { %v1442_v33 = vadd.f32 %v1441_v31, %v3435_v11  ;;  %v1561_v34 = vadd.f32 %v1560_v32, %v3435_v11  ;;  %v1443_v35 = vpop.f32.mrb[45].mxu0  ;;  %v1562_v0 = vpop.f32.mrb[45].mxu1 }
 0x210   : > { %v1444_v37 = vadd.f32 %v1443_v35, %v3435_v11  ;;  %v1563_v40 = vadd.f32 %v1562_v0, %v3435_v11 }
 0x211   : > { %2143 = vst [vmem:[%s3395_s30 + $0x2a0] sm:$0xff] %v1442_v33  ;;  %2145 = vst [vmem:[%s3395_s30 + $0x2b0] sm:$0xff] %v1561_v34 }
 0x212   : > { %2144 = vst [vmem:[%s3395_s30 + $0x2a8] sm:$0xff] %v1444_v37  ;;  %2146 = vst [vmem:[%s3395_s30 + $0x2b8] sm:$0xff] %v1563_v40  ;;  %v1447_v41 = vpop.f32.mrb[46].mxu0  ;;  %v1566_v42 = vpop.f32.mrb[46].mxu1 }
 0x213   : > { %v1448_v43 = vadd.f32 %v1447_v41, %v3445_v20  ;;  %v1567_v44 = vadd.f32 %v1566_v42, %v3445_v20  ;;  %v1449_v45 = vpop.f32.mrb[47].mxu0  ;;  %v1568_v46 = vpop.f32.mrb[47].mxu1 }
 0x214   : > { %v1450_v48 = vadd.f32 %v1449_v45, %v3445_v20  ;;  %v1569_v49 = vadd.f32 %v1568_v46, %v3445_v20 }
 0x215   : > { %2159 = vst [vmem:[%s3395_s30 + $0x320] sm:$0xff] %v1448_v43  ;;  %2161 = vst [vmem:[%s3395_s30 + $0x330] sm:$0xff] %v1567_v44 }
 0x216   : > { %2160 = vst [vmem:[%s3395_s30 + $0x328] sm:$0xff] %v1450_v48  ;;  %2162 = vst [vmem:[%s3395_s30 + $0x338] sm:$0xff] %v1569_v49  ;;  %v1453_v50 = vpop.f32.mrb[48].mxu0  ;;  %v1572_v51 = vpop.f32.mrb[48].mxu1 }
 0x217   : > { %v1454_v52 = vadd.f32 %v1453_v50, %v3455_v28  ;;  %v1573_v53 = vadd.f32 %v1572_v51, %v3455_v28  ;;  %v1455_v54 = vpop.f32.mrb[49].mxu0  ;;  %v1574_v55 = vpop.f32.mrb[49].mxu1 }
 0x218   : > { %v1456_v57 = vadd.f32 %v1455_v54, %v3455_v28  ;;  %v1575_v58 = vadd.f32 %v1574_v55, %v3455_v28 }
 0x219   : > { %2175 = vst [vmem:[%s3395_s30 + $0x3a0] sm:$0xff] %v1454_v52  ;;  %2177 = vst [vmem:[%s3395_s30 + $0x3b0] sm:$0xff] %v1573_v53 }
 0x21a   : > { %2176 = vst [vmem:[%s3395_s30 + $0x3a8] sm:$0xff] %v1456_v57  ;;  %2178 = vst [vmem:[%s3395_s30 + $0x3b8] sm:$0xff] %v1575_v58  ;;  %v1459_v59 = vpop.f32.mrb[50].mxu0  ;;  %v1578_v60 = vpop.f32.mrb[50].mxu1 }
 0x21b   : > { %v1460_v61 = vadd.f32 %v1459_v59, %v3465_v39  ;;  %v1579_v62 = vadd.f32 %v1578_v60, %v3465_v39  ;;  %v1461_v63 = vpop.f32.mrb[51].mxu0  ;;  %v1580_v1 = vpop.f32.mrb[51].mxu1 }
 0x21c   : > { %v1462_v3 = vadd.f32 %v1461_v63, %v3465_v39  ;;  %v1581_v4 = vadd.f32 %v1580_v1, %v3465_v39 }
 0x21d   : > { %2191 = vst [vmem:[%s3395_s30 + $0x420] sm:$0xff] %v1460_v61  ;;  %2193 = vst [vmem:[%s3395_s30 + $0x430] sm:$0xff] %v1579_v62 }
 0x21e   : > { %2192 = vst [vmem:[%s3395_s30 + $0x428] sm:$0xff] %v1462_v3  ;;  %2194 = vst [vmem:[%s3395_s30 + $0x438] sm:$0xff] %v1581_v4  ;;  %v1649_v5 = vpop.f32.mrb[52].mxu0  ;;  %v1768_v6 = vpop.f32.mrb[52].mxu1 }
 0x21f   : > { %v1650_v7 = vadd.f32 %v1649_v5, %v3387_v12  ;;  %v1769_v8 = vadd.f32 %v1768_v6, %v3387_v12  ;;  %v1651_v9 = vpop.f32.mrb[53].mxu0  ;;  %v1770_v10 = vpop.f32.mrb[53].mxu1 }
 0x220   : > { %v1652_v30 = vadd.f32 %v1651_v9, %v3387_v12  ;;  %v1771_v13 = vadd.f32 %v1770_v10, %v3387_v12 }
 0x221   : > { %2067 = vst [vmem:[%s3395_s30 + $0x40] sm:$0xff] %v1650_v7  ;;  %2069 = vst [vmem:[%s3395_s30 + $0x50] sm:$0xff] %v1769_v8 }
 0x222   : > { %2068 = vst [vmem:[%s3395_s30 + $0x48] sm:$0xff] %v1652_v30  ;;  %2070 = vst [vmem:[%s3395_s30 + $0x58] sm:$0xff] %v1771_v13  ;;  %v1655_v14 = vpop.f32.mrb[54].mxu0  ;;  %v1774_v15 = vpop.f32.mrb[54].mxu1 }
 0x223   : > { %v1656_v16 = vadd.f32 %v1655_v14, %v3393_v38  ;;  %v1775_v17 = vadd.f32 %v1774_v15, %v3393_v38  ;;  %v1657_v18 = vpop.f32.mrb[55].mxu0  ;;  %v1776_v19 = vpop.f32.mrb[55].mxu1 }
 0x224   : > { %v1658_v21 = vadd.f32 %v1657_v18, %v3393_v38  ;;  %v1777_v36 = vadd.f32 %v1776_v19, %v3393_v38 }
 0x225   : > { %2083 = vst [vmem:[%s3395_s30 + $0xc0] sm:$0xff] %v1656_v16  ;;  %2085 = vst [vmem:[%s3395_s30 + $0xd0] sm:$0xff] %v1775_v17 }
 0x226   : > { %2084 = vst [vmem:[%s3395_s30 + $0xc8] sm:$0xff] %v1658_v21  ;;  %2086 = vst [vmem:[%s3395_s30 + $0xd8] sm:$0xff] %v1777_v36  ;;  %v1661_v22 = vpop.f32.mrb[56].mxu0  ;;  %v1780_v23 = vpop.f32.mrb[56].mxu1 }
 0x227   : > { %v1662_v24 = vadd.f32 %v1661_v22, %v3405_v47  ;;  %v1781_v25 = vadd.f32 %v1780_v23, %v3405_v47  ;;  %v1663_v26 = vpop.f32.mrb[57].mxu0  ;;  %v1782_v27 = vpop.f32.mrb[57].mxu1 }
 0x228   : > { %v1664_v29 = vadd.f32 %v1663_v26, %v3405_v47  ;;  %v1783_v31 = vadd.f32 %v1782_v27, %v3405_v47 }
 0x229   : > { %2099 = vst [vmem:[%s3395_s30 + $0x140] sm:$0xff] %v1662_v24  ;;  %2101 = vst [vmem:[%s3395_s30 + $0x150] sm:$0xff] %v1781_v25 }
 0x22a   : > { %2100 = vst [vmem:[%s3395_s30 + $0x148] sm:$0xff] %v1664_v29  ;;  %2102 = vst [vmem:[%s3395_s30 + $0x158] sm:$0xff] %v1783_v31  ;;  %v1667_v32 = vpop.f32.mrb[58].mxu0  ;;  %v1786_v33 = vpop.f32.mrb[58].mxu1 }
 0x22b   : > { %v1668_v34 = vadd.f32 %v1667_v32, %v3415_v56  ;;  %v1787_v35 = vadd.f32 %v1786_v33, %v3415_v56  ;;  %v1669_v0 = vpop.f32.mrb[59].mxu0  ;;  %v1788_v37 = vpop.f32.mrb[59].mxu1 }
 0x22c   : > { %v1670_v40 = vadd.f32 %v1669_v0, %v3415_v56  ;;  %v1789_v41 = vadd.f32 %v1788_v37, %v3415_v56 }
 0x22d   : > { %2115 = vst [vmem:[%s3395_s30 + $0x1c0] sm:$0xff] %v1668_v34  ;;  %2117 = vst [vmem:[%s3395_s30 + $0x1d0] sm:$0xff] %v1787_v35 }
 0x22e   : > { %2116 = vst [vmem:[%s3395_s30 + $0x1c8] sm:$0xff] %v1670_v40  ;;  %2118 = vst [vmem:[%s3395_s30 + $0x1d8] sm:$0xff] %v1789_v41  ;;  %v1673_v42 = vpop.f32.mrb[60].mxu0  ;;  %v1792_v43 = vpop.f32.mrb[60].mxu1 }
 0x22f   : > { %v1674_v44 = vadd.f32 %v1673_v42, %v3425_v2  ;;  %v1793_v45 = vadd.f32 %v1792_v43, %v3425_v2  ;;  %v1675_v46 = vpop.f32.mrb[61].mxu0  ;;  %v1794_v48 = vpop.f32.mrb[61].mxu1 }
 0x230   : > { %v1676_v49 = vadd.f32 %v1675_v46, %v3425_v2  ;;  %v1795_v50 = vadd.f32 %v1794_v48, %v3425_v2 }
 0x231   : > { %2131 = vst [vmem:[%s3395_s30 + $0x240] sm:$0xff] %v1674_v44  ;;  %2133 = vst [vmem:[%s3395_s30 + $0x250] sm:$0xff] %v1793_v45 }
 0x232   : > { %2132 = vst [vmem:[%s3395_s30 + $0x248] sm:$0xff] %v1676_v49  ;;  %2134 = vst [vmem:[%s3395_s30 + $0x258] sm:$0xff] %v1795_v50  ;;  %v1679_v51 = vpop.f32.mrb[62].mxu0  ;;  %v1798_v52 = vpop.f32.mrb[62].mxu1 }
 0x233   : > { %v1680_v53 = vadd.f32 %v1679_v51, %v3435_v11  ;;  %v1799_v54 = vadd.f32 %v1798_v52, %v3435_v11  ;;  %v1681_v55 = vpop.f32.mrb[63].mxu0  ;;  %v1800_v57 = vpop.f32.mrb[63].mxu1 }
 0x234   : > { %v1682_v58 = vadd.f32 %v1681_v55, %v3435_v11  ;;  %v1801_v59 = vadd.f32 %v1800_v57, %v3435_v11 }
 0x235   : > { %2147 = vst [vmem:[%s3395_s30 + $0x2c0] sm:$0xff] %v1680_v53  ;;  %2149 = vst [vmem:[%s3395_s30 + $0x2d0] sm:$0xff] %v1799_v54 }
 0x236   : > { %2148 = vst [vmem:[%s3395_s30 + $0x2c8] sm:$0xff] %v1682_v58  ;;  %2150 = vst [vmem:[%s3395_s30 + $0x2d8] sm:$0xff] %v1801_v59  ;;  %v1685_v60 = vpop.f32.mrb[64].mxu0  ;;  %v1804_v61 = vpop.f32.mrb[64].mxu1 }
 0x237   : > { %v1686_v62 = vadd.f32 %v1685_v60, %v3445_v20  ;;  %v1805_v63 = vadd.f32 %v1804_v61, %v3445_v20  ;;  %v1687_v1 = vpop.f32.mrb[65].mxu0  ;;  %v1806_v3 = vpop.f32.mrb[65].mxu1 }
 0x238   : > { %v1688_v4 = vadd.f32 %v1687_v1, %v3445_v20  ;;  %v1807_v5 = vadd.f32 %v1806_v3, %v3445_v20 }
 0x239   : > { %2163 = vst [vmem:[%s3395_s30 + $0x340] sm:$0xff] %v1686_v62  ;;  %2165 = vst [vmem:[%s3395_s30 + $0x350] sm:$0xff] %v1805_v63 }
 0x23a   : > { %2164 = vst [vmem:[%s3395_s30 + $0x348] sm:$0xff] %v1688_v4  ;;  %2166 = vst [vmem:[%s3395_s30 + $0x358] sm:$0xff] %v1807_v5  ;;  %v1691_v6 = vpop.f32.mrb[66].mxu0  ;;  %v1810_v7 = vpop.f32.mrb[66].mxu1 }
 0x23b   : > { %v1692_v8 = vadd.f32 %v1691_v6, %v3455_v28  ;;  %v1811_v9 = vadd.f32 %v1810_v7, %v3455_v28  ;;  %v1693_v10 = vpop.f32.mrb[67].mxu0  ;;  %v1812_v30 = vpop.f32.mrb[67].mxu1 }
 0x23c   : > { %v1694_v13 = vadd.f32 %v1693_v10, %v3455_v28  ;;  %v1813_v14 = vadd.f32 %v1812_v30, %v3455_v28 }
 0x23d   : > { %2179 = vst [vmem:[%s3395_s30 + $0x3c0] sm:$0xff] %v1692_v8  ;;  %2181 = vst [vmem:[%s3395_s30 + $0x3d0] sm:$0xff] %v1811_v9 }
 0x23e   : > { %2180 = vst [vmem:[%s3395_s30 + $0x3c8] sm:$0xff] %v1694_v13  ;;  %2182 = vst [vmem:[%s3395_s30 + $0x3d8] sm:$0xff] %v1813_v14  ;;  %v1697_v15 = vpop.f32.mrb[68].mxu0  ;;  %v1816_v16 = vpop.f32.mrb[68].mxu1 }
 0x23f   : > { %v1698_v17 = vadd.f32 %v1697_v15, %v3465_v39  ;;  %v1817_v18 = vadd.f32 %v1816_v16, %v3465_v39  ;;  %v1699_v19 = vpop.f32.mrb[69].mxu0  ;;  %v1818_v21 = vpop.f32.mrb[69].mxu1 }
 0x240   : > { %v1700_v36 = vadd.f32 %v1699_v19, %v3465_v39  ;;  %v1819_v22 = vadd.f32 %v1818_v21, %v3465_v39 }
 0x241   : > { %2195 = vst [vmem:[%s3395_s30 + $0x440] sm:$0xff] %v1698_v17  ;;  %2197 = vst [vmem:[%s3395_s30 + $0x450] sm:$0xff] %v1817_v18 }
 0x242   : > { %2196 = vst [vmem:[%s3395_s30 + $0x448] sm:$0xff] %v1700_v36  ;;  %2198 = vst [vmem:[%s3395_s30 + $0x458] sm:$0xff] %v1819_v22  ;;  %v1887_v23 = vpop.f32.mrb[70].mxu0  ;;  %v2006_v24 = vpop.f32.mrb[70].mxu1 }
 0x243   : > { %v1888_v25 = vadd.f32 %v1887_v23, %v3387_v12  ;;  %v2007_v26 = vadd.f32 %v2006_v24, %v3387_v12  ;;  %v1889_v27 = vpop.f32.mrb[71].mxu0  ;;  %v2008_v29 = vpop.f32.mrb[71].mxu1 }
 0x244   : > { %v1890_v31 = vadd.f32 %v1889_v27, %v3387_v12  ;;  %v2009_v32 = vadd.f32 %v2008_v29, %v3387_v12 }
 0x245   : > { %2071 = vst [vmem:[%s3395_s30 + $0x60] sm:$0xff] %v1888_v25  ;;  %2073 = vst [vmem:[%s3395_s30 + $0x70] sm:$0xff] %v2007_v26 }
 0x246   : > { %2072 = vst [vmem:[%s3395_s30 + $0x68] sm:$0xff] %v1890_v31  ;;  %2074 = vst [vmem:[%s3395_s30 + $0x78] sm:$0xff] %v2009_v32  ;;  %v1893_v33 = vpop.f32.mrb[72].mxu0  ;;  %v2012_v34 = vpop.f32.mrb[72].mxu1 }
 0x247   : > { %v1894_v35 = vadd.f32 %v1893_v33, %v3393_v38  ;;  %v2013_v0 = vadd.f32 %v2012_v34, %v3393_v38  ;;  %v1895_v37 = vpop.f32.mrb[73].mxu0  ;;  %v2014_v40 = vpop.f32.mrb[73].mxu1 }
 0x248   : > { %v1896_v41 = vadd.f32 %v1895_v37, %v3393_v38  ;;  %v2015_v12 = vadd.f32 %v2014_v40, %v3393_v38  ;;  %v2235_v37 = vld [vmem:[%s3395_s30 + $0x20] sm:$0xff] (%p2966_p5)  ;;  %v2237_v40 = vld [vmem:[%s3395_s30 + $0x28] sm:$0xff] (%p2966_p5) }
 0x249   : > { %2087 = vst [vmem:[%s3395_s30 + $0xe0] sm:$0xff] %v1894_v35  ;;  %2089 = vst [vmem:[%s3395_s30 + $0xf0] sm:$0xff] %v2013_v0  ;;  %v2231_v35 = vld [vmem:[%s3395_s30 + $0x10] sm:$0xff] (%p2966_p5)  ;;  %v2233_v0 = vld [vmem:[%s3395_s30 + $0x18] sm:$0xff] (%p2966_p5) }
 0x24a   : > { %2088 = vst [vmem:[%s3395_s30 + $0xe8] sm:$0xff] %v1896_v41  ;;  %2090 = vst [vmem:[%s3395_s30 + $0xf8] sm:$0xff] %v2015_v12  ;;  %v1899_v42 = vpop.f32.mrb[74].mxu0  ;;  %v2018_v43 = vpop.f32.mrb[74].mxu1  ;;  %v2239_v41 = vld [vmem:[%s3395_s30 + $0x30] sm:$0xff] (%p2966_p5)  ;;  %v2241_v12 = vld [vmem:[%s3395_s30 + $0x38] sm:$0xff] (%p2966_p5) }
 0x24b   : > { %v1900_v44 = vadd.f32 %v1899_v42, %v3405_v47  ;;  %v2019_v45 = vadd.f32 %v2018_v43, %v3405_v47  ;;  %v1901_v46 = vpop.f32.mrb[75].mxu0  ;;  %v2020_v48 = vpop.f32.mrb[75].mxu1  ;;  %v2243_v42 = vld [vmem:[%s3395_s30 + $0x40] sm:$0xff] (%p2966_p5)  ;;  %v2245_v43 = vld [vmem:[%s3395_s30 + $0x48] sm:$0xff] (%p2966_p5)  ;;  %2232 = vst [vmem:[%s3714_s21 + $0x10] sm:$0xff] (%p2966_p5), %v2231_v35  ;;  %2234 = vst [vmem:[%s3714_s21 + $0x18] sm:$0xff] (%p2966_p5), %v2233_v0 }
 0x24c   : > { %v1902_v49 = vadd.f32 %v1901_v46, %v3405_v47  ;;  %v2021_v38 = vadd.f32 %v2020_v48, %v3405_v47  ;;  %v2251_v46 = vld [vmem:[%s3395_s30 + $0x60] sm:$0xff] (%p2966_p5)  ;;  %2236 = vst [vmem:[%s3714_s21 + $0x20] sm:$0xff] (%p2966_p5), %v2235_v37  ;;  %2238 = vst [vmem:[%s3714_s21 + $0x28] sm:$0xff] (%p2966_p5), %v2237_v40  ;;  %v2359_v35 = vld [vmem:[%s3395_s30 + $0x210] sm:$0xff] (%p2966_p5) }
 0x24d   : > { %2103 = vst [vmem:[%s3395_s30 + $0x160] sm:$0xff] %v1900_v44  ;;  %2105 = vst [vmem:[%s3395_s30 + $0x170] sm:$0xff] %v2019_v45  ;;  %v2247_v44 = vld [vmem:[%s3395_s30 + $0x50] sm:$0xff] (%p2966_p5)  ;;  %v2249_v45 = vld [vmem:[%s3395_s30 + $0x58] sm:$0xff] (%p2966_p5) }
 0x24e   : > { %2104 = vst [vmem:[%s3395_s30 + $0x168] sm:$0xff] %v1902_v49  ;;  %2106 = vst [vmem:[%s3395_s30 + $0x178] sm:$0xff] %v2021_v38  ;;  %v1905_v50 = vpop.f32.mrb[76].mxu0  ;;  %v2024_v51 = vpop.f32.mrb[76].mxu1  ;;  %v2253_v48 = vld [vmem:[%s3395_s30 + $0x68] sm:$0xff] (%p2966_p5)  ;;  %v2255_v49 = vld [vmem:[%s3395_s30 + $0x70] sm:$0xff] (%p2966_p5) }
 0x24f   : > { %v1906_v52 = vadd.f32 %v1905_v50, %v3415_v56  ;;  %v2025_v53 = vadd.f32 %v2024_v51, %v3415_v56  ;;  %v1907_v54 = vpop.f32.mrb[77].mxu0  ;;  %v2026_v55 = vpop.f32.mrb[77].mxu1  ;;  %2240 = vst [vmem:[%s3714_s21 + $0x30] sm:$0xff] (%p2966_p5), %v2239_v41  ;;  %2242 = vst [vmem:[%s3714_s21 + $0x38] sm:$0xff] (%p2966_p5), %v2241_v12  ;;  %v2257_v38 = vld [vmem:[%s3395_s30 + $0x78] sm:$0xff] (%p2966_p5)  ;;  %v2259_v50 = vld [vmem:[%s3395_s30 + $0x80] sm:$0xff] (%p2966_p5) }
 0x250   : > { %v1908_v57 = vadd.f32 %v1907_v54, %v3415_v56  ;;  %v2027_v47 = vadd.f32 %v2026_v55, %v3415_v56  ;;  %2244 = vst [vmem:[%s3714_s21 + $0x40] sm:$0xff] (%p2966_p5), %v2243_v42  ;;  %2246 = vst [vmem:[%s3714_s21 + $0x48] sm:$0xff] (%p2966_p5), %v2245_v43  ;;  %v2261_v51 = vld [vmem:[%s3395_s30 + $0x88] sm:$0xff] (%p2966_p5)  ;;  %v2267_v54 = vld [vmem:[%s3395_s30 + $0xa0] sm:$0xff] (%p2966_p5) }
 0x251   : > { %2119 = vst [vmem:[%s3395_s30 + $0x1e0] sm:$0xff] %v1906_v52  ;;  %2121 = vst [vmem:[%s3395_s30 + $0x1f0] sm:$0xff] %v2025_v53  ;;  %v2263_v52 = vld [vmem:[%s3395_s30 + $0x90] sm:$0xff] (%p2966_p5)  ;;  %v2265_v53 = vld [vmem:[%s3395_s30 + $0x98] sm:$0xff] (%p2966_p5) }
 0x252   : > { %2120 = vst [vmem:[%s3395_s30 + $0x1e8] sm:$0xff] %v1908_v57  ;;  %2122 = vst [vmem:[%s3395_s30 + $0x1f8] sm:$0xff] %v2027_v47  ;;  %v1911_v58 = vpop.f32.mrb[78].mxu0  ;;  %v2030_v59 = vpop.f32.mrb[78].mxu1  ;;  %v2269_v55 = vld [vmem:[%s3395_s30 + $0xa8] sm:$0xff] (%p2966_p5)  ;;  %v2271_v57 = vld [vmem:[%s3395_s30 + $0xb0] sm:$0xff] (%p2966_p5) }
 0x253   : > { %v1912_v60 = vadd.f32 %v1911_v58, %v3425_v2  ;;  %v2031_v61 = vadd.f32 %v2030_v59, %v3425_v2  ;;  %v1913_v62 = vpop.f32.mrb[79].mxu0  ;;  %v2032_v63 = vpop.f32.mrb[79].mxu1  ;;  %2248 = vst [vmem:[%s3714_s21 + $0x50] sm:$0xff] (%p2966_p5), %v2247_v44  ;;  %2250 = vst [vmem:[%s3714_s21 + $0x58] sm:$0xff] (%p2966_p5), %v2249_v45  ;;  %v2273_v47 = vld [vmem:[%s3395_s30 + $0xb8] sm:$0xff] (%p2966_p5)  ;;  %v2275_v58 = vld [vmem:[%s3395_s30 + $0xc0] sm:$0xff] (%p2966_p5) }
 0x254   : > { %v1914_v1 = vadd.f32 %v1913_v62, %v3425_v2  ;;  %v2033_v56 = vadd.f32 %v2032_v63, %v3425_v2  ;;  %2252 = vst [vmem:[%s3714_s21 + $0x60] sm:$0xff] (%p2966_p5), %v2251_v46  ;;  %2254 = vst [vmem:[%s3714_s21 + $0x68] sm:$0xff] (%p2966_p5), %v2253_v48  ;;  %v2277_v59 = vld [vmem:[%s3395_s30 + $0xc8] sm:$0xff] (%p2966_p5)  ;;  %v2283_v62 = vld [vmem:[%s3395_s30 + $0xe0] sm:$0xff] (%p2966_p5) }
 0x255   : > { %2135 = vst [vmem:[%s3395_s30 + $0x260] sm:$0xff] %v1912_v60  ;;  %2137 = vst [vmem:[%s3395_s30 + $0x270] sm:$0xff] %v2031_v61  ;;  %v2279_v60 = vld [vmem:[%s3395_s30 + $0xd0] sm:$0xff] (%p2966_p5)  ;;  %v2281_v61 = vld [vmem:[%s3395_s30 + $0xd8] sm:$0xff] (%p2966_p5) }
 0x256   : > { %2136 = vst [vmem:[%s3395_s30 + $0x268] sm:$0xff] %v1914_v1  ;;  %2138 = vst [vmem:[%s3395_s30 + $0x278] sm:$0xff] %v2033_v56  ;;  %v1917_v3 = vpop.f32.mrb[80].mxu0  ;;  %v2036_v4 = vpop.f32.mrb[80].mxu1  ;;  %v2285_v63 = vld [vmem:[%s3395_s30 + $0xe8] sm:$0xff] (%p2966_p5)  ;;  %v2287_v1 = vld [vmem:[%s3395_s30 + $0xf0] sm:$0xff] (%p2966_p5) }
 0x257   : > { %v1918_v5 = vadd.f32 %v1917_v3, %v3435_v11  ;;  %v2037_v6 = vadd.f32 %v2036_v4, %v3435_v11  ;;  %v1919_v7 = vpop.f32.mrb[81].mxu0  ;;  %v2038_v8 = vpop.f32.mrb[81].mxu1  ;;  %2256 = vst [vmem:[%s3714_s21 + $0x70] sm:$0xff] (%p2966_p5), %v2255_v49  ;;  %2258 = vst [vmem:[%s3714_s21 + $0x78] sm:$0xff] (%p2966_p5), %v2257_v38  ;;  %v2289_v56 = vld [vmem:[%s3395_s30 + $0xf8] sm:$0xff] (%p2966_p5)  ;;  %v2291_v3 = vld [vmem:[%s3395_s30 + $0x100] sm:$0xff] (%p2966_p5) }
 0x258   : > { %v1920_v9 = vadd.f32 %v1919_v7, %v3435_v11  ;;  %v2039_v2 = vadd.f32 %v2038_v8, %v3435_v11  ;;  %2260 = vst [vmem:[%s3714_s21 + $0x100] sm:$0xff] (%p2966_p5), %v2259_v50  ;;  %2262 = vst [vmem:[%s3714_s21 + $0x108] sm:$0xff] (%p2966_p5), %v2261_v51  ;;  %v2293_v4 = vld [vmem:[%s3395_s30 + $0x108] sm:$0xff] (%p2966_p5)  ;;  %v2299_v7 = vld [vmem:[%s3395_s30 + $0x120] sm:$0xff] (%p2966_p5) }
 0x259   : > { %2151 = vst [vmem:[%s3395_s30 + $0x2e0] sm:$0xff] %v1918_v5  ;;  %2153 = vst [vmem:[%s3395_s30 + $0x2f0] sm:$0xff] %v2037_v6  ;;  %v2295_v5 = vld [vmem:[%s3395_s30 + $0x110] sm:$0xff] (%p2966_p5)  ;;  %v2297_v6 = vld [vmem:[%s3395_s30 + $0x118] sm:$0xff] (%p2966_p5) }
 0x25a   : > { %2152 = vst [vmem:[%s3395_s30 + $0x2e8] sm:$0xff] %v1920_v9  ;;  %2154 = vst [vmem:[%s3395_s30 + $0x2f8] sm:$0xff] %v2039_v2  ;;  %v1923_v10 = vpop.f32.mrb[82].mxu0  ;;  %v2042_v30 = vpop.f32.mrb[82].mxu1  ;;  %v2301_v8 = vld [vmem:[%s3395_s30 + $0x128] sm:$0xff] (%p2966_p5)  ;;  %v2303_v9 = vld [vmem:[%s3395_s30 + $0x130] sm:$0xff] (%p2966_p5) }
 0x25b   : > { %v1924_v13 = vadd.f32 %v1923_v10, %v3445_v20  ;;  %v2043_v14 = vadd.f32 %v2042_v30, %v3445_v20  ;;  %v1925_v15 = vpop.f32.mrb[83].mxu0  ;;  %v2044_v16 = vpop.f32.mrb[83].mxu1  ;;  %2264 = vst [vmem:[%s3714_s21 + $0x110] sm:$0xff] (%p2966_p5), %v2263_v52  ;;  %2266 = vst [vmem:[%s3714_s21 + $0x118] sm:$0xff] (%p2966_p5), %v2265_v53  ;;  %v2305_v2 = vld [vmem:[%s3395_s30 + $0x138] sm:$0xff] (%p2966_p5)  ;;  %v2307_v10 = vld [vmem:[%s3395_s30 + $0x140] sm:$0xff] (%p2966_p5) }
 0x25c   : > { %v1926_v17 = vadd.f32 %v1925_v15, %v3445_v20  ;;  %v2045_v11 = vadd.f32 %v2044_v16, %v3445_v20  ;;  %2268 = vst [vmem:[%s3714_s21 + $0x120] sm:$0xff] (%p2966_p5), %v2267_v54  ;;  %2270 = vst [vmem:[%s3714_s21 + $0x128] sm:$0xff] (%p2966_p5), %v2269_v55  ;;  %v2309_v30 = vld [vmem:[%s3395_s30 + $0x148] sm:$0xff] (%p2966_p5)  ;;  %v2315_v15 = vld [vmem:[%s3395_s30 + $0x160] sm:$0xff] (%p2966_p5) }
 0x25d   : > { %2167 = vst [vmem:[%s3395_s30 + $0x360] sm:$0xff] %v1924_v13  ;;  %2169 = vst [vmem:[%s3395_s30 + $0x370] sm:$0xff] %v2043_v14  ;;  %v2311_v13 = vld [vmem:[%s3395_s30 + $0x150] sm:$0xff] (%p2966_p5)  ;;  %v2313_v14 = vld [vmem:[%s3395_s30 + $0x158] sm:$0xff] (%p2966_p5) }
 0x25e   : > { %2168 = vst [vmem:[%s3395_s30 + $0x368] sm:$0xff] %v1926_v17  ;;  %2170 = vst [vmem:[%s3395_s30 + $0x378] sm:$0xff] %v2045_v11  ;;  %v1929_v18 = vpop.f32.mrb[84].mxu0  ;;  %v2048_v19 = vpop.f32.mrb[84].mxu1  ;;  %v2317_v16 = vld [vmem:[%s3395_s30 + $0x168] sm:$0xff] (%p2966_p5)  ;;  %v2319_v17 = vld [vmem:[%s3395_s30 + $0x170] sm:$0xff] (%p2966_p5) }
 0x25f   : > { %v1930_v21 = vadd.f32 %v1929_v18, %v3455_v28  ;;  %v2049_v36 = vadd.f32 %v2048_v19, %v3455_v28  ;;  %v1931_v22 = vpop.f32.mrb[85].mxu0  ;;  %v2050_v23 = vpop.f32.mrb[85].mxu1  ;;  %2272 = vst [vmem:[%s3714_s21 + $0x130] sm:$0xff] (%p2966_p5), %v2271_v57  ;;  %2274 = vst [vmem:[%s3714_s21 + $0x138] sm:$0xff] (%p2966_p5), %v2273_v47  ;;  %v2321_v11 = vld [vmem:[%s3395_s30 + $0x178] sm:$0xff] (%p2966_p5)  ;;  %v2323_v18 = vld [vmem:[%s3395_s30 + $0x180] sm:$0xff] (%p2966_p5) }
 0x260   : > { %v1932_v24 = vadd.f32 %v1931_v22, %v3455_v28  ;;  %v2051_v20 = vadd.f32 %v2050_v23, %v3455_v28  ;;  %2209 = sbr.rel (!%p2966_p5) target bundleno = 673 (0x2a1), region = 44  ;;  %v2227_v28 = vld [vmem:[%s3395_s30] sm:$0xff] (%p2966_p5)  ;;  %2276 = vst [vmem:[%s3714_s21 + $0x140] sm:$0xff] (%p2966_p5), %v2275_v58  ;;  %2278 = vst [vmem:[%s3714_s21 + $0x148] sm:$0xff] (%p2966_p5), %v2277_v59  ;;  %v2325_v19 = vld [vmem:[%s3395_s30 + $0x188] sm:$0xff] (%p2966_p5) }
 0x261   : > { %2183 = vst [vmem:[%s3395_s30 + $0x3e0] sm:$0xff] %v1930_v21  ;;  %2185 = vst [vmem:[%s3395_s30 + $0x3f0] sm:$0xff] %v2049_v36  ;;  %v2327_v21 = vld [vmem:[%s3395_s30 + $0x190] sm:$0xff] (%p2966_p5)  ;;  %v2329_v36 = vld [vmem:[%s3395_s30 + $0x198] sm:$0xff] (%p2966_p5) }
 0x262   : > { %2184 = vst [vmem:[%s3395_s30 + $0x3e8] sm:$0xff] %v1932_v24  ;;  %2186 = vst [vmem:[%s3395_s30 + $0x3f8] sm:$0xff] %v2051_v20  ;;  %v1935_v25 = vpop.f32.mrb[86].mxu0  ;;  %v2054_v26 = vpop.f32.mrb[86].mxu1  ;;  %v2331_v22 = vld [vmem:[%s3395_s30 + $0x1a0] sm:$0xff] (%p2966_p5)  ;;  %v2333_v23 = vld [vmem:[%s3395_s30 + $0x1a8] sm:$0xff] (%p2966_p5) }
 0x263   : > { %v1936_v27 = vadd.f32 %v1935_v25, %v3465_v39  ;;  %v2055_v29 = vadd.f32 %v2054_v26, %v3465_v39  ;;  %v1937_v31 = vpop.f32.mrb[87].mxu0  ;;  %v2056_v32 = vpop.f32.mrb[87].mxu1  ;;  %2228 = vst [vmem:[%s3714_s21] sm:$0xff] (%p2966_p5), %v2227_v28  ;;  %2280 = vst [vmem:[%s3714_s21 + $0x150] sm:$0xff] (%p2966_p5), %v2279_v60  ;;  %v2335_v24 = vld [vmem:[%s3395_s30 + $0x1b0] sm:$0xff] (%p2966_p5)  ;;  %v2337_v20 = vld [vmem:[%s3395_s30 + $0x1b8] sm:$0xff] (%p2966_p5) }
 0x264   : > { %v1938_v33 = vadd.f32 %v1937_v31, %v3465_v39  ;;  %v2057_v34 = vadd.f32 %v2056_v32, %v3465_v39  ;;  %v2229_v39 = vld [vmem:[%s3395_s30 + $0x8] sm:$0xff] (%p2966_p5)  ;;  %2282 = vst [vmem:[%s3714_s21 + $0x158] sm:$0xff] (%p2966_p5), %v2281_v61  ;;  %2284 = vst [vmem:[%s3714_s21 + $0x160] sm:$0xff] (%p2966_p5), %v2283_v62  ;;  %v2339_v25 = vld [vmem:[%s3395_s30 + $0x1c0] sm:$0xff] (%p2966_p5) }
 0x265   : > { %2199 = vst [vmem:[%s3395_s30 + $0x460] sm:$0xff] %v1936_v27  ;;  %2201 = vst [vmem:[%s3395_s30 + $0x470] sm:$0xff] %v2055_v29  ;;  %v2341_v26 = vld [vmem:[%s3395_s30 + $0x1c8] sm:$0xff] (%p2966_p5)  ;;  %v2343_v27 = vld [vmem:[%s3395_s30 + $0x1d0] sm:$0xff] (%p2966_p5) }
 0x266   : > { %2200 = vst [vmem:[%s3395_s30 + $0x468] sm:$0xff] %v1938_v33  ;;  %2202 = vst [vmem:[%s3395_s30 + $0x478] sm:$0xff] %v2057_v34  ;;  %v2345_v29 = vld [vmem:[%s3395_s30 + $0x1d8] sm:$0xff] (%p2966_p5)  ;;  %v2347_v31 = vld [vmem:[%s3395_s30 + $0x1e0] sm:$0xff] (%p2966_p5) }
 0x267   : > { %2230 = vst [vmem:[%s3714_s21 + $0x8] sm:$0xff] %v2229_v39  ;;  %2286 = vst [vmem:[%s3714_s21 + $0x168] sm:$0xff] %v2285_v63  ;;  %v2349_v32 = vld [vmem:[%s3395_s30 + $0x1e8] sm:$0xff]  ;;  %v2351_v33 = vld [vmem:[%s3395_s30 + $0x1f0] sm:$0xff] }
 0x268   : > { %2288 = vst [vmem:[%s3714_s21 + $0x170] sm:$0xff] %v2287_v1  ;;  %2290 = vst [vmem:[%s3714_s21 + $0x178] sm:$0xff] %v2289_v56  ;;  %v2353_v34 = vld [vmem:[%s3395_s30 + $0x1f8] sm:$0xff]  ;;  %v2355_v28 = vld [vmem:[%s3395_s30 + $0x200] sm:$0xff] }
 0x269   : > { %2292 = vst [vmem:[%s3714_s21 + $0x200] sm:$0xff] %v2291_v3  ;;  %2294 = vst [vmem:[%s3714_s21 + $0x208] sm:$0xff] %v2293_v4  ;;  %v2357_v39 = vld [vmem:[%s3395_s30 + $0x208] sm:$0xff]  ;;  %v2361_v0 = vld [vmem:[%s3395_s30 + $0x218] sm:$0xff] }
 0x26a   : > { %2296 = vst [vmem:[%s3714_s21 + $0x210] sm:$0xff] %v2295_v5  ;;  %2298 = vst [vmem:[%s3714_s21 + $0x218] sm:$0xff] %v2297_v6  ;;  %v2363_v37 = vld [vmem:[%s3395_s30 + $0x220] sm:$0xff]  ;;  %v2365_v40 = vld [vmem:[%s3395_s30 + $0x228] sm:$0xff] }
 0x26b   : > { %2300 = vst [vmem:[%s3714_s21 + $0x220] sm:$0xff] %v2299_v7  ;;  %2302 = vst [vmem:[%s3714_s21 + $0x228] sm:$0xff] %v2301_v8  ;;  %v2367_v41 = vld [vmem:[%s3395_s30 + $0x230] sm:$0xff]  ;;  %v2369_v12 = vld [vmem:[%s3395_s30 + $0x238] sm:$0xff] }
 0x26c   : > { %2304 = vst [vmem:[%s3714_s21 + $0x230] sm:$0xff] %v2303_v9  ;;  %2306 = vst [vmem:[%s3714_s21 + $0x238] sm:$0xff] %v2305_v2  ;;  %v2371_v42 = vld [vmem:[%s3395_s30 + $0x240] sm:$0xff]  ;;  %v2373_v43 = vld [vmem:[%s3395_s30 + $0x248] sm:$0xff] }
 0x26d   : > { %2308 = vst [vmem:[%s3714_s21 + $0x240] sm:$0xff] %v2307_v10  ;;  %2310 = vst [vmem:[%s3714_s21 + $0x248] sm:$0xff] %v2309_v30  ;;  %v2375_v44 = vld [vmem:[%s3395_s30 + $0x250] sm:$0xff]  ;;  %v2377_v45 = vld [vmem:[%s3395_s30 + $0x258] sm:$0xff] }
 0x26e   : > { %2312 = vst [vmem:[%s3714_s21 + $0x250] sm:$0xff] %v2311_v13  ;;  %2314 = vst [vmem:[%s3714_s21 + $0x258] sm:$0xff] %v2313_v14  ;;  %v2379_v46 = vld [vmem:[%s3395_s30 + $0x260] sm:$0xff]  ;;  %v2381_v48 = vld [vmem:[%s3395_s30 + $0x268] sm:$0xff] }
 0x26f   : > { %2316 = vst [vmem:[%s3714_s21 + $0x260] sm:$0xff] %v2315_v15  ;;  %2318 = vst [vmem:[%s3714_s21 + $0x268] sm:$0xff] %v2317_v16  ;;  %v2383_v49 = vld [vmem:[%s3395_s30 + $0x270] sm:$0xff]  ;;  %v2385_v38 = vld [vmem:[%s3395_s30 + $0x278] sm:$0xff] }
 0x270   : > { %2320 = vst [vmem:[%s3714_s21 + $0x270] sm:$0xff] %v2319_v17  ;;  %2322 = vst [vmem:[%s3714_s21 + $0x278] sm:$0xff] %v2321_v11  ;;  %v2387_v50 = vld [vmem:[%s3395_s30 + $0x280] sm:$0xff]  ;;  %v2389_v51 = vld [vmem:[%s3395_s30 + $0x288] sm:$0xff] }
 0x271   : > { %2324 = vst [vmem:[%s3714_s21 + $0x300] sm:$0xff] %v2323_v18  ;;  %2326 = vst [vmem:[%s3714_s21 + $0x308] sm:$0xff] %v2325_v19  ;;  %v2391_v52 = vld [vmem:[%s3395_s30 + $0x290] sm:$0xff]  ;;  %v2393_v53 = vld [vmem:[%s3395_s30 + $0x298] sm:$0xff] }
 0x272   : > { %2328 = vst [vmem:[%s3714_s21 + $0x310] sm:$0xff] %v2327_v21  ;;  %2330 = vst [vmem:[%s3714_s21 + $0x318] sm:$0xff] %v2329_v36  ;;  %v2395_v54 = vld [vmem:[%s3395_s30 + $0x2a0] sm:$0xff]  ;;  %v2397_v55 = vld [vmem:[%s3395_s30 + $0x2a8] sm:$0xff] }
 0x273   : > { %2332 = vst [vmem:[%s3714_s21 + $0x320] sm:$0xff] %v2331_v22  ;;  %2334 = vst [vmem:[%s3714_s21 + $0x328] sm:$0xff] %v2333_v23  ;;  %v2399_v57 = vld [vmem:[%s3395_s30 + $0x2b0] sm:$0xff]  ;;  %v2401_v47 = vld [vmem:[%s3395_s30 + $0x2b8] sm:$0xff] }
 0x274   : > { %2336 = vst [vmem:[%s3714_s21 + $0x330] sm:$0xff] %v2335_v24  ;;  %2338 = vst [vmem:[%s3714_s21 + $0x338] sm:$0xff] %v2337_v20  ;;  %v2403_v58 = vld [vmem:[%s3395_s30 + $0x2c0] sm:$0xff]  ;;  %v2405_v59 = vld [vmem:[%s3395_s30 + $0x2c8] sm:$0xff] }
 0x275   : > { %2340 = vst [vmem:[%s3714_s21 + $0x340] sm:$0xff] %v2339_v25  ;;  %2342 = vst [vmem:[%s3714_s21 + $0x348] sm:$0xff] %v2341_v26  ;;  %v2407_v60 = vld [vmem:[%s3395_s30 + $0x2d0] sm:$0xff]  ;;  %v2409_v61 = vld [vmem:[%s3395_s30 + $0x2d8] sm:$0xff] }
 0x276   : > { %2344 = vst [vmem:[%s3714_s21 + $0x350] sm:$0xff] %v2343_v27  ;;  %2346 = vst [vmem:[%s3714_s21 + $0x358] sm:$0xff] %v2345_v29  ;;  %v2411_v62 = vld [vmem:[%s3395_s30 + $0x2e0] sm:$0xff]  ;;  %v2413_v63 = vld [vmem:[%s3395_s30 + $0x2e8] sm:$0xff] }
 0x277   : > { %2348 = vst [vmem:[%s3714_s21 + $0x360] sm:$0xff] %v2347_v31  ;;  %2350 = vst [vmem:[%s3714_s21 + $0x368] sm:$0xff] %v2349_v32  ;;  %v2415_v1 = vld [vmem:[%s3395_s30 + $0x2f0] sm:$0xff]  ;;  %v2417_v56 = vld [vmem:[%s3395_s30 + $0x2f8] sm:$0xff] }
 0x278   : > { %2352 = vst [vmem:[%s3714_s21 + $0x370] sm:$0xff] %v2351_v33  ;;  %2354 = vst [vmem:[%s3714_s21 + $0x378] sm:$0xff] %v2353_v34  ;;  %v2419_v3 = vld [vmem:[%s3395_s30 + $0x300] sm:$0xff]  ;;  %v2421_v4 = vld [vmem:[%s3395_s30 + $0x308] sm:$0xff] }
 0x279   : > { %2356 = vst [vmem:[%s3714_s21 + $0x400] sm:$0xff] %v2355_v28  ;;  %2358 = vst [vmem:[%s3714_s21 + $0x408] sm:$0xff] %v2357_v39  ;;  %v2423_v5 = vld [vmem:[%s3395_s30 + $0x310] sm:$0xff]  ;;  %v2425_v6 = vld [vmem:[%s3395_s30 + $0x318] sm:$0xff] }
 0x27a   : > { %2360 = vst [vmem:[%s3714_s21 + $0x410] sm:$0xff] %v2359_v35  ;;  %2362 = vst [vmem:[%s3714_s21 + $0x418] sm:$0xff] %v2361_v0  ;;  %v2427_v7 = vld [vmem:[%s3395_s30 + $0x320] sm:$0xff]  ;;  %v2429_v8 = vld [vmem:[%s3395_s30 + $0x328] sm:$0xff] }
 0x27b   : > { %2364 = vst [vmem:[%s3714_s21 + $0x420] sm:$0xff] %v2363_v37  ;;  %2366 = vst [vmem:[%s3714_s21 + $0x428] sm:$0xff] %v2365_v40  ;;  %v2431_v9 = vld [vmem:[%s3395_s30 + $0x330] sm:$0xff]  ;;  %v2433_v2 = vld [vmem:[%s3395_s30 + $0x338] sm:$0xff] }
 0x27c   : > { %2368 = vst [vmem:[%s3714_s21 + $0x430] sm:$0xff] %v2367_v41  ;;  %2370 = vst [vmem:[%s3714_s21 + $0x438] sm:$0xff] %v2369_v12  ;;  %v2435_v10 = vld [vmem:[%s3395_s30 + $0x340] sm:$0xff]  ;;  %v2437_v30 = vld [vmem:[%s3395_s30 + $0x348] sm:$0xff] }
 0x27d   : > { %2372 = vst [vmem:[%s3714_s21 + $0x440] sm:$0xff] %v2371_v42  ;;  %2374 = vst [vmem:[%s3714_s21 + $0x448] sm:$0xff] %v2373_v43  ;;  %v2439_v13 = vld [vmem:[%s3395_s30 + $0x350] sm:$0xff]  ;;  %v2441_v14 = vld [vmem:[%s3395_s30 + $0x358] sm:$0xff] }
 0x27e   : > { %2376 = vst [vmem:[%s3714_s21 + $0x450] sm:$0xff] %v2375_v44  ;;  %2378 = vst [vmem:[%s3714_s21 + $0x458] sm:$0xff] %v2377_v45  ;;  %v2443_v15 = vld [vmem:[%s3395_s30 + $0x360] sm:$0xff]  ;;  %v2445_v16 = vld [vmem:[%s3395_s30 + $0x368] sm:$0xff] }
 0x27f   : > { %2380 = vst [vmem:[%s3714_s21 + $0x460] sm:$0xff] %v2379_v46  ;;  %2382 = vst [vmem:[%s3714_s21 + $0x468] sm:$0xff] %v2381_v48  ;;  %v2447_v17 = vld [vmem:[%s3395_s30 + $0x370] sm:$0xff]  ;;  %v2449_v11 = vld [vmem:[%s3395_s30 + $0x378] sm:$0xff] }
 0x280   : > { %2384 = vst [vmem:[%s3714_s21 + $0x470] sm:$0xff] %v2383_v49  ;;  %2386 = vst [vmem:[%s3714_s21 + $0x478] sm:$0xff] %v2385_v38  ;;  %v2451_v18 = vld [vmem:[%s3395_s30 + $0x380] sm:$0xff]  ;;  %v2453_v19 = vld [vmem:[%s3395_s30 + $0x388] sm:$0xff] }
 0x281   : > { %2388 = vst [vmem:[%s3714_s21 + $0x500] sm:$0xff] %v2387_v50  ;;  %2390 = vst [vmem:[%s3714_s21 + $0x508] sm:$0xff] %v2389_v51  ;;  %v2455_v21 = vld [vmem:[%s3395_s30 + $0x390] sm:$0xff]  ;;  %v2457_v36 = vld [vmem:[%s3395_s30 + $0x398] sm:$0xff] }
 0x282   : > { %2392 = vst [vmem:[%s3714_s21 + $0x510] sm:$0xff] %v2391_v52  ;;  %2394 = vst [vmem:[%s3714_s21 + $0x518] sm:$0xff] %v2393_v53  ;;  %v2459_v22 = vld [vmem:[%s3395_s30 + $0x3a0] sm:$0xff]  ;;  %v2461_v23 = vld [vmem:[%s3395_s30 + $0x3a8] sm:$0xff] }
 0x283   : > { %2396 = vst [vmem:[%s3714_s21 + $0x520] sm:$0xff] %v2395_v54  ;;  %2398 = vst [vmem:[%s3714_s21 + $0x528] sm:$0xff] %v2397_v55  ;;  %v2463_v24 = vld [vmem:[%s3395_s30 + $0x3b0] sm:$0xff]  ;;  %v2465_v20 = vld [vmem:[%s3395_s30 + $0x3b8] sm:$0xff] }
 0x284   : > { %2400 = vst [vmem:[%s3714_s21 + $0x530] sm:$0xff] %v2399_v57  ;;  %2402 = vst [vmem:[%s3714_s21 + $0x538] sm:$0xff] %v2401_v47  ;;  %v2467_v25 = vld [vmem:[%s3395_s30 + $0x3c0] sm:$0xff]  ;;  %v2469_v26 = vld [vmem:[%s3395_s30 + $0x3c8] sm:$0xff] }
 0x285   : > { %2404 = vst [vmem:[%s3714_s21 + $0x540] sm:$0xff] %v2403_v58  ;;  %2406 = vst [vmem:[%s3714_s21 + $0x548] sm:$0xff] %v2405_v59  ;;  %v2471_v27 = vld [vmem:[%s3395_s30 + $0x3d0] sm:$0xff]  ;;  %v2473_v29 = vld [vmem:[%s3395_s30 + $0x3d8] sm:$0xff] }
 0x286   : > { %2408 = vst [vmem:[%s3714_s21 + $0x550] sm:$0xff] %v2407_v60  ;;  %2410 = vst [vmem:[%s3714_s21 + $0x558] sm:$0xff] %v2409_v61  ;;  %v2475_v31 = vld [vmem:[%s3395_s30 + $0x3e0] sm:$0xff]  ;;  %v2477_v32 = vld [vmem:[%s3395_s30 + $0x3e8] sm:$0xff] }
 0x287   : > { %2412 = vst [vmem:[%s3714_s21 + $0x560] sm:$0xff] %v2411_v62  ;;  %2414 = vst [vmem:[%s3714_s21 + $0x568] sm:$0xff] %v2413_v63  ;;  %v2479_v33 = vld [vmem:[%s3395_s30 + $0x3f0] sm:$0xff]  ;;  %v2481_v34 = vld [vmem:[%s3395_s30 + $0x3f8] sm:$0xff] }
 0x288   : > { %2416 = vst [vmem:[%s3714_s21 + $0x570] sm:$0xff] %v2415_v1  ;;  %2418 = vst [vmem:[%s3714_s21 + $0x578] sm:$0xff] %v2417_v56  ;;  %v2483_v28 = vld [vmem:[%s3395_s30 + $0x400] sm:$0xff]  ;;  %v2485_v39 = vld [vmem:[%s3395_s30 + $0x408] sm:$0xff] }
 0x289   : > { %2420 = vst [vmem:[%s3714_s21 + $0x600] sm:$0xff] %v2419_v3  ;;  %2422 = vst [vmem:[%s3714_s21 + $0x608] sm:$0xff] %v2421_v4  ;;  %v2487_v35 = vld [vmem:[%s3395_s30 + $0x410] sm:$0xff]  ;;  %v2489_v0 = vld [vmem:[%s3395_s30 + $0x418] sm:$0xff] }
 0x28a   : > { %2424 = vst [vmem:[%s3714_s21 + $0x610] sm:$0xff] %v2423_v5  ;;  %2426 = vst [vmem:[%s3714_s21 + $0x618] sm:$0xff] %v2425_v6  ;;  %v2491_v37 = vld [vmem:[%s3395_s30 + $0x420] sm:$0xff]  ;;  %v2493_v40 = vld [vmem:[%s3395_s30 + $0x428] sm:$0xff] }
 0x28b   : > { %2428 = vst [vmem:[%s3714_s21 + $0x620] sm:$0xff] %v2427_v7  ;;  %2430 = vst [vmem:[%s3714_s21 + $0x628] sm:$0xff] %v2429_v8  ;;  %v2495_v41 = vld [vmem:[%s3395_s30 + $0x430] sm:$0xff]  ;;  %v2497_v12 = vld [vmem:[%s3395_s30 + $0x438] sm:$0xff] }
 0x28c   : > { %2432 = vst [vmem:[%s3714_s21 + $0x630] sm:$0xff] %v2431_v9  ;;  %2434 = vst [vmem:[%s3714_s21 + $0x638] sm:$0xff] %v2433_v2  ;;  %v2499_v42 = vld [vmem:[%s3395_s30 + $0x440] sm:$0xff]  ;;  %v2501_v43 = vld [vmem:[%s3395_s30 + $0x448] sm:$0xff] }
 0x28d   : > { %2436 = vst [vmem:[%s3714_s21 + $0x640] sm:$0xff] %v2435_v10  ;;  %2438 = vst [vmem:[%s3714_s21 + $0x648] sm:$0xff] %v2437_v30  ;;  %v2503_v44 = vld [vmem:[%s3395_s30 + $0x450] sm:$0xff]  ;;  %v2505_v45 = vld [vmem:[%s3395_s30 + $0x458] sm:$0xff] }
 0x28e   : > { %2440 = vst [vmem:[%s3714_s21 + $0x650] sm:$0xff] %v2439_v13  ;;  %2442 = vst [vmem:[%s3714_s21 + $0x658] sm:$0xff] %v2441_v14  ;;  %v2507_v46 = vld [vmem:[%s3395_s30 + $0x460] sm:$0xff]  ;;  %v2509_v48 = vld [vmem:[%s3395_s30 + $0x468] sm:$0xff] }
 0x28f   : > { %2444 = vst [vmem:[%s3714_s21 + $0x660] sm:$0xff] %v2443_v15  ;;  %2446 = vst [vmem:[%s3714_s21 + $0x668] sm:$0xff] %v2445_v16  ;;  %v2511_v49 = vld [vmem:[%s3395_s30 + $0x470] sm:$0xff]  ;;  %v2513_v38 = vld [vmem:[%s3395_s30 + $0x478] sm:$0xff] }
 0x290   : > { %2448 = vst [vmem:[%s3714_s21 + $0x670] sm:$0xff] %v2447_v17  ;;  %2450 = vst [vmem:[%s3714_s21 + $0x678] sm:$0xff] %v2449_v11 }
 0x291   : > { %2452 = vst [vmem:[%s3714_s21 + $0x700] sm:$0xff] %v2451_v18  ;;  %2454 = vst [vmem:[%s3714_s21 + $0x708] sm:$0xff] %v2453_v19 }
 0x292   : > { %2456 = vst [vmem:[%s3714_s21 + $0x710] sm:$0xff] %v2455_v21  ;;  %2458 = vst [vmem:[%s3714_s21 + $0x718] sm:$0xff] %v2457_v36 }
 0x293   : > { %2460 = vst [vmem:[%s3714_s21 + $0x720] sm:$0xff] %v2459_v22  ;;  %2462 = vst [vmem:[%s3714_s21 + $0x728] sm:$0xff] %v2461_v23 }
 0x294   : > { %2464 = vst [vmem:[%s3714_s21 + $0x730] sm:$0xff] %v2463_v24  ;;  %2466 = vst [vmem:[%s3714_s21 + $0x738] sm:$0xff] %v2465_v20 }
 0x295   : > { %2468 = vst [vmem:[%s3714_s21 + $0x740] sm:$0xff] %v2467_v25  ;;  %2470 = vst [vmem:[%s3714_s21 + $0x748] sm:$0xff] %v2469_v26 }
 0x296   : > { %2472 = vst [vmem:[%s3714_s21 + $0x750] sm:$0xff] %v2471_v27  ;;  %2474 = vst [vmem:[%s3714_s21 + $0x758] sm:$0xff] %v2473_v29 }
 0x297   : > { %2476 = vst [vmem:[%s3714_s21 + $0x760] sm:$0xff] %v2475_v31  ;;  %2478 = vst [vmem:[%s3714_s21 + $0x768] sm:$0xff] %v2477_v32 }
 0x298   : > { %2480 = vst [vmem:[%s3714_s21 + $0x770] sm:$0xff] %v2479_v33  ;;  %2482 = vst [vmem:[%s3714_s21 + $0x778] sm:$0xff] %v2481_v34 }
 0x299   : > { %2484 = vst [vmem:[%s3714_s21 + $0x800] sm:$0xff] %v2483_v28  ;;  %2486 = vst [vmem:[%s3714_s21 + $0x808] sm:$0xff] %v2485_v39 }
 0x29a   : > { %2488 = vst [vmem:[%s3714_s21 + $0x810] sm:$0xff] %v2487_v35  ;;  %2490 = vst [vmem:[%s3714_s21 + $0x818] sm:$0xff] %v2489_v0 }
 0x29b   : > { %2492 = vst [vmem:[%s3714_s21 + $0x820] sm:$0xff] %v2491_v37  ;;  %2494 = vst [vmem:[%s3714_s21 + $0x828] sm:$0xff] %v2493_v40 }
 0x29c   : > { %2496 = vst [vmem:[%s3714_s21 + $0x830] sm:$0xff] %v2495_v41  ;;  %2498 = vst [vmem:[%s3714_s21 + $0x838] sm:$0xff] %v2497_v12 }
 0x29d   : > { %2500 = vst [vmem:[%s3714_s21 + $0x840] sm:$0xff] %v2499_v42  ;;  %2502 = vst [vmem:[%s3714_s21 + $0x848] sm:$0xff] %v2501_v43 }
 0x29e   : > { %2504 = vst [vmem:[%s3714_s21 + $0x850] sm:$0xff] %v2503_v44  ;;  %2506 = vst [vmem:[%s3714_s21 + $0x858] sm:$0xff] %v2505_v45 }
 0x29f   : > { %2508 = vst [vmem:[%s3714_s21 + $0x860] sm:$0xff] %v2507_v46  ;;  %2510 = vst [vmem:[%s3714_s21 + $0x868] sm:$0xff] %v2509_v48 }
 0x2a0   : > { %2512 = vst [vmem:[%s3714_s21 + $0x870] sm:$0xff] %v2511_v49  ;;  %2514 = vst [vmem:[%s3714_s21 + $0x878] sm:$0xff] %v2513_v38 }
 0x2a1 PF: > { %s15_s24 = sadd.s32 1, %s2888_s24   ;;  %s4020_s18 = smov %s2868_s19 }
 0x2a2   : > { %p12_p11 = scmp.ge.s32.totalorder %s15_s24, 6   ;;  %s4021_s19 = smov %s2977_s8 }
 0x2a3   : > { %s4022_s20 = smov %s2880_s22  ;;  %s4023_s21 = smov %s2884_s23 }
 0x2a4   : > { %s4024_s22 = smov %s4027_s25  ;;  %s4025_s23 = smov %s4031_s26 }
 0x2a5   :  { %14 = sbr.rel (!%p12_p11) target bundleno = 4 (0x4), region = 99 }

// kernel: squeeze.12
= control target key start
LH: loop header
LB: loop body
LE: loop exit
PB: predicated region body
PF: predicated region fallthrough
CT: control target
= control target key end

     0   :  { %vm3_vm0 = vcmask 572416   ;;  %s596_s0 = inlined_call_operand.vmem [shape: f32[1,70,288], index: 0, kind: input, shape index: {}]   ;;  %s597_s1 = inlined_call_operand.vmem [shape: f32[70,2,12,12], index: 1, kind: output, shape index: {}]  }
   0x1   :  { %v2_v0 = vld [vmem:[%s596_s0] sm:$0xff]   ;;  %v204_v1 = vld [vmem:[%s596_s0 + $0x8] sm:$0xff]   ;;  %v207_v2 = vld [vmem:[%s596_s0 + $0x10] sm:$0xff]  }
   0x2   :  { %4 = vst.msk [vmem:[%s597_s1] sm:$0xff] %vm3_vm0, %v2_v0   ;;  %205 = vst.msk [vmem:[%s597_s1 + $0x8] sm:$0xf] %vm3_vm0, %v204_v1   ;;  %v209_v3 = vld [vmem:[%s596_s0 + $0x18] sm:$0xff]   ;;  %v211_v4 = vld [vmem:[%s596_s0 + $0x20] sm:$0xff]  }
   0x3   :  { %206 = vst.msk [vmem:[%s597_s1 + $0xc] sm:$0xf0] %vm3_vm0, %v204_v1   ;;  %208 = vst.msk [vmem:[%s597_s1 + $0x14] sm:$0xff] %vm3_vm0, %v207_v2   ;;  %v214_v5 = vld [vmem:[%s596_s0 + $0x28] sm:$0xff]   ;;  %v216_v6 = vld [vmem:[%s596_s0 + $0x30] sm:$0xff]  }
   0x4   :  { %210 = vst.msk [vmem:[%s597_s1 + $0x20] sm:$0xff] %vm3_vm0, %v209_v3   ;;  %212 = vst.msk [vmem:[%s597_s1 + $0x28] sm:$0xf] %vm3_vm0, %v211_v4   ;;  %v218_v7 = vld [vmem:[%s596_s0 + $0x38] sm:$0xff]   ;;  %v221_v8 = vld [vmem:[%s596_s0 + $0x40] sm:$0xff]  }
   0x5   :  { %213 = vst.msk [vmem:[%s597_s1 + $0x2c] sm:$0xf0] %vm3_vm0, %v211_v4   ;;  %215 = vst.msk [vmem:[%s597_s1 + $0x34] sm:$0xff] %vm3_vm0, %v214_v5   ;;  %v223_v9 = vld [vmem:[%s596_s0 + $0x48] sm:$0xff]   ;;  %v225_v10 = vld [vmem:[%s596_s0 + $0x50] sm:$0xff]  }
   0x6   :  { %217 = vst.msk [vmem:[%s597_s1 + $0x40] sm:$0xff] %vm3_vm0, %v216_v6   ;;  %219 = vst.msk [vmem:[%s597_s1 + $0x48] sm:$0xf] %vm3_vm0, %v218_v7   ;;  %v228_v11 = vld [vmem:[%s596_s0 + $0x58] sm:$0xff]   ;;  %v230_v12 = vld [vmem:[%s596_s0 + $0x60] sm:$0xff]  }
   0x7   :  { %220 = vst.msk [vmem:[%s597_s1 + $0x4c] sm:$0xf0] %vm3_vm0, %v218_v7   ;;  %222 = vst.msk [vmem:[%s597_s1 + $0x54] sm:$0xff] %vm3_vm0, %v221_v8   ;;  %v232_v13 = vld [vmem:[%s596_s0 + $0x68] sm:$0xff]   ;;  %v235_v14 = vld [vmem:[%s596_s0 + $0x70] sm:$0xff]  }
   0x8   :  { %224 = vst.msk [vmem:[%s597_s1 + $0x60] sm:$0xff] %vm3_vm0, %v223_v9   ;;  %226 = vst.msk [vmem:[%s597_s1 + $0x68] sm:$0xf] %vm3_vm0, %v225_v10   ;;  %v237_v15 = vld [vmem:[%s596_s0 + $0x78] sm:$0xff]   ;;  %v239_v16 = vld [vmem:[%s596_s0 + $0x80] sm:$0xff]  }
   0x9   :  { %227 = vst.msk [vmem:[%s597_s1 + $0x6c] sm:$0xf0] %vm3_vm0, %v225_v10   ;;  %229 = vst.msk [vmem:[%s597_s1 + $0x74] sm:$0xff] %vm3_vm0, %v228_v11   ;;  %v242_v17 = vld [vmem:[%s596_s0 + $0x88] sm:$0xff]   ;;  %v244_v18 = vld [vmem:[%s596_s0 + $0x90] sm:$0xff]  }
   0xa   :  { %231 = vst.msk [vmem:[%s597_s1 + $0x80] sm:$0xff] %vm3_vm0, %v230_v12   ;;  %233 = vst.msk [vmem:[%s597_s1 + $0x88] sm:$0xf] %vm3_vm0, %v232_v13   ;;  %v246_v19 = vld [vmem:[%s596_s0 + $0x98] sm:$0xff]   ;;  %v249_v20 = vld [vmem:[%s596_s0 + $0xa0] sm:$0xff]  }
   0xb   :  { %234 = vst.msk [vmem:[%s597_s1 + $0x8c] sm:$0xf0] %vm3_vm0, %v232_v13   ;;  %236 = vst.msk [vmem:[%s597_s1 + $0x94] sm:$0xff] %vm3_vm0, %v235_v14   ;;  %v251_v21 = vld [vmem:[%s596_s0 + $0xa8] sm:$0xff]   ;;  %v253_v22 = vld [vmem:[%s596_s0 + $0xb0] sm:$0xff]  }
   0xc   :  { %238 = vst.msk [vmem:[%s597_s1 + $0xa0] sm:$0xff] %vm3_vm0, %v237_v15   ;;  %240 = vst.msk [vmem:[%s597_s1 + $0xa8] sm:$0xf] %vm3_vm0, %v239_v16   ;;  %v256_v23 = vld [vmem:[%s596_s0 + $0xb8] sm:$0xff]   ;;  %v258_v24 = vld [vmem:[%s596_s0 + $0xc0] sm:$0xff]  }
   0xd   :  { %241 = vst.msk [vmem:[%s597_s1 + $0xac] sm:$0xf0] %vm3_vm0, %v239_v16   ;;  %243 = vst.msk [vmem:[%s597_s1 + $0xb4] sm:$0xff] %vm3_vm0, %v242_v17   ;;  %v260_v25 = vld [vmem:[%s596_s0 + $0xc8] sm:$0xff]   ;;  %v263_v26 = vld [vmem:[%s596_s0 + $0xd0] sm:$0xff]  }
   0xe   :  { %245 = vst.msk [vmem:[%s597_s1 + $0xc0] sm:$0xff] %vm3_vm0, %v244_v18   ;;  %247 = vst.msk [vmem:[%s597_s1 + $0xc8] sm:$0xf] %vm3_vm0, %v246_v19   ;;  %v265_v27 = vld [vmem:[%s596_s0 + $0xd8] sm:$0xff]   ;;  %v267_v28 = vld [vmem:[%s596_s0 + $0xe0] sm:$0xff]  }
   0xf   :  { %248 = vst.msk [vmem:[%s597_s1 + $0xcc] sm:$0xf0] %vm3_vm0, %v246_v19   ;;  %250 = vst.msk [vmem:[%s597_s1 + $0xd4] sm:$0xff] %vm3_vm0, %v249_v20   ;;  %v270_v29 = vld [vmem:[%s596_s0 + $0xe8] sm:$0xff]   ;;  %v272_v30 = vld [vmem:[%s596_s0 + $0xf0] sm:$0xff]  }
  0x10   :  { %252 = vst.msk [vmem:[%s597_s1 + $0xe0] sm:$0xff] %vm3_vm0, %v251_v21   ;;  %254 = vst.msk [vmem:[%s597_s1 + $0xe8] sm:$0xf] %vm3_vm0, %v253_v22   ;;  %v274_v31 = vld [vmem:[%s596_s0 + $0xf8] sm:$0xff]   ;;  %v277_v32 = vld [vmem:[%s596_s0 + $0x100] sm:$0xff]  }
  0x11   :  { %255 = vst.msk [vmem:[%s597_s1 + $0xec] sm:$0xf0] %vm3_vm0, %v253_v22   ;;  %257 = vst.msk [vmem:[%s597_s1 + $0xf4] sm:$0xff] %vm3_vm0, %v256_v23   ;;  %v279_v33 = vld [vmem:[%s596_s0 + $0x108] sm:$0xff]   ;;  %v281_v34 = vld [vmem:[%s596_s0 + $0x110] sm:$0xff]  }
  0x12   :  { %259 = vst.msk [vmem:[%s597_s1 + $0x100] sm:$0xff] %vm3_vm0, %v258_v24   ;;  %261 = vst.msk [vmem:[%s597_s1 + $0x108] sm:$0xf] %vm3_vm0, %v260_v25   ;;  %v284_v35 = vld [vmem:[%s596_s0 + $0x118] sm:$0xff]  }
  0x13   :  { %262 = vst.msk [vmem:[%s597_s1 + $0x10c] sm:$0xf0] %vm3_vm0, %v260_v25   ;;  %264 = vst.msk [vmem:[%s597_s1 + $0x114] sm:$0xff] %vm3_vm0, %v263_v26  }
  0x14   :  { %266 = vst.msk [vmem:[%s597_s1 + $0x120] sm:$0xff] %vm3_vm0, %v265_v27   ;;  %268 = vst.msk [vmem:[%s597_s1 + $0x128] sm:$0xf] %vm3_vm0, %v267_v28  }
  0x15   :  { %269 = vst.msk [vmem:[%s597_s1 + $0x12c] sm:$0xf0] %vm3_vm0, %v267_v28   ;;  %271 = vst.msk [vmem:[%s597_s1 + $0x134] sm:$0xff] %vm3_vm0, %v270_v29  }
  0x16   :  { %273 = vst.msk [vmem:[%s597_s1 + $0x140] sm:$0xff] %vm3_vm0, %v272_v30   ;;  %275 = vst.msk [vmem:[%s597_s1 + $0x148] sm:$0xf] %vm3_vm0, %v274_v31  }
  0x17   :  { %276 = vst.msk [vmem:[%s597_s1 + $0x14c] sm:$0xf0] %vm3_vm0, %v274_v31   ;;  %278 = vst.msk [vmem:[%s597_s1 + $0x154] sm:$0xff] %vm3_vm0, %v277_v32  }
  0x18   :  { %280 = vst.msk [vmem:[%s597_s1 + $0x160] sm:$0xff] %vm3_vm0, %v279_v33   ;;  %282 = vst.msk [vmem:[%s597_s1 + $0x168] sm:$0xf] %vm3_vm0, %v281_v34  }
  0x19   :  { %283 = vst.msk [vmem:[%s597_s1 + $0x16c] sm:$0xf0] %vm3_vm0, %v281_v34   ;;  %285 = vst.msk [vmem:[%s597_s1 + $0x174] sm:$0xff] %vm3_vm0, %v284_v35  }

// kernel: squeeze.14
= control target key start
LH: loop header
LB: loop body
LE: loop exit
PB: predicated region body
PF: predicated region fallthrough
CT: control target
= control target key end

     0   :  { %vm3_vm0 = vcmask 572416   ;;  %s162_s0 = inlined_call_operand.vmem [shape: f32[1,70,50], index: 0, kind: input, shape index: {}]   ;;  %s163_s1 = inlined_call_operand.vmem [shape: f32[70,2,5,5], index: 1, kind: output, shape index: {}]  }
   0x1   :  { %v2_v0 = vld [vmem:[%s162_s0] sm:$0xff]   ;;  %v52_v1 = vld [vmem:[%s162_s0 + $0x8] sm:$0xff]   ;;  %v56_v2 = vld [vmem:[%s162_s0 + $0x10] sm:$0xff]  }
   0x2   :  { %4 = vst.msk [vmem:[%s163_s1] sm:$0x1f] %vm3_vm0, %v2_v0   ;;  %51 = vst.msk [vmem:[%s163_s1 + $0x3] sm:$0xe0] %vm3_vm0, %v2_v0   ;;  %v59_v3 = vld [vmem:[%s162_s0 + $0x18] sm:$0xff]   ;;  %v63_v4 = vld [vmem:[%s162_s0 + $0x20] sm:$0xff]  }
   0x3   :  { %53 = vst.msk [vmem:[%s163_s1 + $0xb] sm:$0x3] %vm3_vm0, %v52_v1   ;;  %54 = vst.msk [vmem:[%s163_s1 + $0xe] sm:$0x7c] %vm3_vm0, %v52_v1   ;;  %v66_v5 = vld [vmem:[%s162_s0 + $0x28] sm:$0xff]  }
   0x4   :  { %55 = vst.msk [vmem:[%s163_s1 + $0x11] sm:$0x80] %vm3_vm0, %v52_v1   ;;  %57 = vst.msk [vmem:[%s163_s1 + $0x19] sm:$0xf] %vm3_vm0, %v56_v2   ;;  %v69_v6 = vld [vmem:[%s162_s0 + $0x30] sm:$0x3]  }
   0x5   :  { %58 = vst.msk [vmem:[%s163_s1 + $0x1c] sm:$0xf0] %vm3_vm0, %v56_v2   ;;  %60 = vst.msk [vmem:[%s163_s1 + $0x24] ss:$4 sm:$0x3] %vm3_vm0, %v59_v3  }
   0x6   :  { %61 = vst.msk [vmem:[%s163_s1 + $0x27] sm:$0x3c] %vm3_vm0, %v59_v3   ;;  %62 = vst.msk [vmem:[%s163_s1 + $0x2a] sm:$0xc0] %vm3_vm0, %v59_v3  }
   0x7   :  { %64 = vst.msk [vmem:[%s163_s1 + $0x32] sm:$0x7] %vm3_vm0, %v63_v4   ;;  %65 = vst.msk [vmem:[%s163_s1 + $0x35] sm:$0xf8] %vm3_vm0, %v63_v4  }
   0x8   :  { %67 = vst.msk [vmem:[%s163_s1 + $0x40] sm:$0x1f] %vm3_vm0, %v66_v5   ;;  %68 = vst.msk [vmem:[%s163_s1 + $0x43] sm:$0xe0] %vm3_vm0, %v66_v5  }
   0x9   :  { %70 = vst.msk [vmem:[%s163_s1 + $0x4b] sm:$0x3] %vm3_vm0, %v69_v6  }

</bundles_post_ra>
